<compile_context>
chip_gen: v5e
topology: v5e:2x2
jax: 0.10.0
libtpu: 0.0.40
codegen_flags: <defaults>
</compile_context>

<pallas_src>
import functools

import jax
import jax.numpy as jnp
from jax.experimental import pallas as pl
from jax.experimental.pallas import tpu as pltpu

# Deterministic "parameters" from __init__ (sigma, epsilon, cutoff) + DEFAULT_BETA.
BETA = 0.3
SIGMA = 1.0
EPSILON = 1.0          # used as the interaction scale A (forward passes epsilon)
CUTOFF = 2.5 * SIGMA


def _particle_life_kernel(pos_cm_ref, posj_ref, pT_ref, out_ref, acc_ref, *,
                          beta, sigma, eps, cutoff, fold_cutoff):
    """Row-tile of particles (lanes) vs one column-tile of particles (sublanes)."""
    k = pl.program_id(1)
    nk = pl.num_programs(1)

    @pl.when(k == 0)
    def _init():
        acc_ref[...] = jnp.zeros_like(acc_ref)

    # row-tile particle coordinates, coordinate-major (3, TM) -> (1, TM) rows
    xi = pos_cm_ref[0:1, :]
    yi = pos_cm_ref[1:2, :]
    zi = pos_cm_ref[2:3, :]
    # column-tile particle coordinates, particle-major (TN, 3) -> (TN, 1) columns
    xj = posj_ref[:, 0:1]
    yj = posj_ref[:, 1:2]
    zj = posj_ref[:, 2:3]

    # pairwise slabs are (TN, TM): sublane = j (column particle), lane = i (row)
    dx = xi - xj                       # pos_i - pos_j (sign irrelevant: only d2 used)
    dy = yi - yj
    dz = zi - zj
    d2 = dx * dx + dy * dy + dz * dz
    inv = jax.lax.rsqrt(d2)            # EUP; +inf on diagonal / identical sentinels
    dist = d2 * inv                    # NaN where d2 == 0 (masked out below)

    # asymmetric_particle_pair_force_jit(dist, A=eps, beta, sigma), single select chain
    pf = jnp.where(
        dist < beta,
        dist * (1.0 / beta) - 1.0,
        jnp.where(
            dist < sigma,
            eps * (1.0 - jnp.abs(2.0 * dist - 1.0 - beta) * (1.0 / (1.0 - beta))),
            0.0,
        ),
    )
    if not fold_cutoff:                # only needed when cutoff < sigma
        pf = jnp.where(dist < cutoff, pf, 0.0)

    # Must be the LAST select: keeps 0*inf = NaN (diagonal) off the MXU reduce.
    fodT = jnp.where(d2 > 0.0, pf * inv, 0.0)      # (pair_forces / distances)^T

    # MXU reduce: (8, TN) @ (TN, TM) -> (8, TM)
    #   rows 0..2 -> sum_j fod * pos_j ; row 3 -> sum_j fod ; rows 4..7 zero-pad
    acc_ref[...] += jnp.dot(pT_ref[...], fodT,
                            preferred_element_type=jnp.float32,
                            precision=jax.lax.Precision.HIGHEST)

    @pl.when(k == nk - 1)
    def _finish():
        acc = acc_ref[...]
        t = acc[0:3, :]                # (3, TM)  sum_j fod * pos_j
        s = acc[3:4, :]                # (1, TM)  sum_j fod
        # forces[i] = 2 * (pos_i * S_i - T_i)  — lane-dense single-shot store
        out_ref[...] = 2.0 * (pos_cm_ref[...] * s - t)


def particle_life_forces(positions, *, beta=BETA, sigma=SIGMA, epsilon=EPSILON,
                         cutoff=CUTOFF, tile_m=128, tile_n=1024):
    """Wrapper: sentinel-pads, builds coordinate-major layouts, launches the kernel."""
    positions = positions.astype(jnp.float32)
    n = positions.shape[0]

    def round_up(a, b):
        return ((a + b - 1) // b) * b

    npad_r = round_up(n, tile_m)
    tn = min(tile_n, round_up(n, 128))
    npad_c = round_up(n, tn)

    # Sentinel padding: padded "particles" sit far outside the interaction range,
    # so padded columns contribute exactly zero force (no index masking needed).
    pad_val = jnp.max(jnp.abs(positions)) + 10.0 * (cutoff + sigma)

    pos_r_pad = jnp.full((npad_r, 3), pad_val, jnp.float32).at[:n].set(positions)
    pos_c_pad = jnp.full((npad_c, 3), pad_val, jnp.float32).at[:n].set(positions)

    pos_cm = pos_r_pad.T                               # (3, npad_r) coord-major rows
    posj = pos_c_pad                                   # (npad_c, 3) particle-major cols
    pT = jnp.zeros((8, npad_c), jnp.float32)
    pT = pT.at[0:3, :].set(pos_c_pad.T)                # [x_j; y_j; z_j]
    pT = pT.at[3, :].set(1.0)                          # ones row -> sum_j fod

    # pf is already 0 for dist >= sigma, so the cutoff mask is redundant iff
    # cutoff >= sigma (true for the defaults) — decided at trace time.
    fold_cutoff = bool(cutoff >= sigma)

    kernel = functools.partial(
        _particle_life_kernel, beta=float(beta), sigma=float(sigma),
        eps=float(epsilon), cutoff=float(cutoff), fold_cutoff=fold_cutoff,
    )

    out_cm = pl.pallas_call(
        kernel,
        out_shape=jax.ShapeDtypeStruct((3, npad_r), jnp.float32),
        grid_spec=pltpu.PrefetchScalarGridSpec(
            num_scalar_prefetch=0,
            grid=(npad_r // tile_m, npad_c // tn),     # (row tiles, col tiles)
            in_specs=[
                pl.BlockSpec((3, tile_m), lambda i, k: (0, i)),   # row tile (resident)
                pl.BlockSpec((tn, 3), lambda i, k: (k, 0)),       # column tile
                pl.BlockSpec((8, tn), lambda i, k: (0, k)),       # [pos_j; 1] for MXU
            ],
            out_specs=pl.BlockSpec((3, tile_m), lambda i, k: (0, i)),
            scratch_shapes=[pltpu.VMEM((8, tile_m), jnp.float32)],
        ),
        compiler_params=pltpu.CompilerParams(
            dimension_semantics=("parallel", "arbitrary"),
            vmem_limit_bytes=32 * 1024 * 1024,
        ),
    )(pos_cm, posj, pT)

    forces = out_cm[:, :n].T
    return {"energy": jnp.asarray(0.0, jnp.float32), "forces": forces}


def _reference_forces(positions, *, beta=BETA, sigma=SIGMA, epsilon=EPSILON, cutoff=CUTOFF):
    """Pure-JAX reference mirroring the PyTorch forward (dense path, pbc=False)."""
    pos = positions.astype(jnp.float32)
    n = pos.shape[0]
    drv = pos[:, None, :] - pos[None, :, :]                    # dr_vec[i,j] = pos[i]-pos[j]
    dist = jnp.sqrt(jnp.sum(drv * drv, axis=-1))
    dist = jnp.where(jnp.eye(n, dtype=bool), jnp.inf, dist)
    mask = dist < cutoff
    inner = jnp.where(dist < beta, dist / beta - 1.0, 0.0)
    outer = jnp.where((dist < sigma) & (dist > beta),
                      epsilon * (1.0 - jnp.abs(2.0 * dist - 1.0 - beta) / (1.0 - beta)),
                      0.0)
    pf = jnp.where(mask, inner + outer, 0.0)
    fod = jnp.where(mask, pf / dist, 0.0)
    fv = fod[:, :, None] * drv
    # forces.index_add_(0, j, -fv); forces.index_add_(0, i, +fv)
    return jnp.sum(fv, axis=1) - jnp.sum(fv, axis=0)


if __name__ == "__main__":
    key = jax.random.PRNGKey(0)
    n_particles = 200                                   # small synthetic system
    # positions in a 5x5x5 box so cutoff=2.5 gives a mix of interacting pairs
    positions = jax.random.uniform(key, (n_particles, 3), dtype=jnp.float32) * 5.0

    out = particle_life_forces(positions)
    forces = jax.block_until_ready(out["forces"])

    ref = _reference_forces(positions)
    assert forces.shape == (n_particles, 3)
    err = float(jnp.max(jnp.abs(forces - ref)))
    assert jnp.allclose(forces, ref, atol=2e-4, rtol=2e-4), err
    print("KERNEL_OK")
</pallas_src>

<mosaic_0001>
module attributes {stable_mosaic.version = 11 : i64} {
  func.func @_particle_life_kernel(%arg0: i32, %arg1: i32, %arg2: memref<3x128xf32, #tpu.memory_space<vmem>>, %arg3: memref<256x3xf32, #tpu.memory_space<vmem>>, %arg4: memref<8x256xf32, #tpu.memory_space<vmem>>, %arg5: memref<3x128xf32, #tpu.memory_space<vmem>>, %arg6: memref<8x128xf32, #tpu.memory_space<vmem>>) attributes {dimension_semantics = [#tpu.dimension_semantics<parallel>, #tpu.dimension_semantics<arbitrary>], iteration_bounds = array<i64: 2, 1>, scalar_prefetch = 0 : i64, scratch_operands = 1 : i64, tpu.core_type = #tpu.core_type<tc>, window_params = [{transform_indices = @transform_0, window_bounds = array<i64: 3, 128>}, {transform_indices = @transform_1, window_bounds = array<i64: 256, 3>}, {transform_indices = @transform_2, window_bounds = array<i64: 8, 256>}, {transform_indices = @transform_3, window_bounds = array<i64: 3, 128>}]} {
    %c0_i32 = arith.constant 0 : i32
    %0 = arith.cmpi eq, %arg1, %c0_i32 : i32
    %1 = arith.extui %0 : i1 to i32
    %c0_i32_0 = arith.constant 0 : i32
    %2 = arith.cmpi ne, %1, %c0_i32_0 : i32
    scf.if %2 {
      %cst_31 = arith.constant 0.000000e+00 : f32
      %62 = vector.broadcast %cst_31 : f32 to vector<8x128xf32>
      %c0_32 = arith.constant 0 : index
      %c0_33 = arith.constant 0 : index
      %63 = vector.load %arg6[%c0_32, %c0_33] : memref<8x128xf32, #tpu.memory_space<vmem>>, vector<8x128xf32>
      tpu.vector_store %arg6[%c0_32, %c0_33], %62 {strides = array<i32>} : memref<8x128xf32, #tpu.memory_space<vmem>>, vector<8x128xf32>,
    } else {
    }
    %c0 = arith.constant 0 : index
    %c0_1 = arith.constant 0 : index
    %3 = vector.load %arg2[%c0, %c0_1] : memref<3x128xf32, #tpu.memory_space<vmem>>, vector<1x128xf32>
    %c1 = arith.constant 1 : index
    %c0_2 = arith.constant 0 : index
    %4 = vector.load %arg2[%c1, %c0_2] : memref<3x128xf32, #tpu.memory_space<vmem>>, vector<1x128xf32>
    %c2 = arith.constant 2 : index
    %c0_3 = arith.constant 0 : index
    %5 = vector.load %arg2[%c2, %c0_3] : memref<3x128xf32, #tpu.memory_space<vmem>>, vector<1x128xf32>
    %c0_4 = arith.constant 0 : index
    %c0_5 = arith.constant 0 : index
    %6 = vector.load %arg3[%c0_4, %c0_5] : memref<256x3xf32, #tpu.memory_space<vmem>>, vector<256x1xf32>
    %c0_6 = arith.constant 0 : index
    %c1_7 = arith.constant 1 : index
    %7 = vector.load %arg3[%c0_6, %c1_7] : memref<256x3xf32, #tpu.memory_space<vmem>>, vector<256x1xf32>
    %c0_8 = arith.constant 0 : index
    %c2_9 = arith.constant 2 : index
    %8 = vector.load %arg3[%c0_8, %c2_9] : memref<256x3xf32, #tpu.memory_space<vmem>>, vector<256x1xf32>
    %9 = vector.broadcast %3 : vector<1x128xf32> to vector<256x128xf32>
    %10 = vector.broadcast %6 : vector<256x1xf32> to vector<256x128xf32>
    %11 = arith.subf %9, %10 : vector<256x128xf32>
    %12 = vector.broadcast %4 : vector<1x128xf32> to vector<256x128xf32>
    %13 = vector.broadcast %7 : vector<256x1xf32> to vector<256x128xf32>
    %14 = arith.subf %12, %13 : vector<256x128xf32>
    %15 = vector.broadcast %5 : vector<1x128xf32> to vector<256x128xf32>
    %16 = vector.broadcast %8 : vector<256x1xf32> to vector<256x128xf32>
    %17 = arith.subf %15, %16 : vector<256x128xf32>
    %18 = arith.mulf %11, %11 : vector<256x128xf32>
    %19 = arith.mulf %14, %14 : vector<256x128xf32>
    %20 = arith.addf %18, %19 : vector<256x128xf32>
    %21 = arith.mulf %17, %17 : vector<256x128xf32>
    %22 = arith.addf %20, %21 : vector<256x128xf32>
    %23 = math.rsqrt %22 : vector<256x128xf32>
    %24 = arith.mulf %22, %23 : vector<256x128xf32>
    %cst = arith.constant 3.000000e-01 : f32
    %25 = vector.broadcast %cst : f32 to vector<256x128xf32>
    %26 = arith.cmpf olt, %24, %25 : vector<256x128xf32>
    %cst_10 = arith.constant 3.33333325 : f32
    %27 = vector.broadcast %cst_10 : f32 to vector<256x128xf32>
    %28 = arith.mulf %24, %27 : vector<256x128xf32>
    %cst_11 = arith.constant 1.000000e+00 : f32
    %29 = vector.broadcast %cst_11 : f32 to vector<256x128xf32>
    %30 = arith.subf %28, %29 : vector<256x128xf32>
    %cst_12 = arith.constant 1.000000e+00 : f32
    %31 = vector.broadcast %cst_12 : f32 to vector<256x128xf32>
    %32 = arith.cmpf olt, %24, %31 : vector<256x128xf32>
    %cst_13 = arith.constant 2.000000e+00 : f32
    %33 = vector.broadcast %cst_13 : f32 to vector<256x128xf32>
    %34 = arith.mulf %33, %24 : vector<256x128xf32>
    %cst_14 = arith.constant 1.000000e+00 : f32
    %35 = vector.broadcast %cst_14 : f32 to vector<256x128xf32>
    %36 = arith.subf %34, %35 : vector<256x128xf32>
    %cst_15 = arith.constant 3.000000e-01 : f32
    %37 = vector.broadcast %cst_15 : f32 to vector<256x128xf32>
    %38 = arith.subf %36, %37 : vector<256x128xf32>
    %39 = math.absf %38 : vector<256x128xf32>
    %cst_16 = arith.constant 1.42857146 : f32
    %40 = vector.broadcast %cst_16 : f32 to vector<256x128xf32>
    %41 = arith.mulf %39, %40 : vector<256x128xf32>
    %cst_17 = arith.constant 1.000000e+00 : f32
    %42 = vector.broadcast %cst_17 : f32 to vector<256x128xf32>
    %43 = arith.subf %42, %41 : vector<256x128xf32>
    %cst_18 = arith.constant 1.000000e+00 : f32
    %44 = vector.broadcast %cst_18 : f32 to vector<256x128xf32>
    %45 = arith.mulf %44, %43 : vector<256x128xf32>
    %cst_19 = arith.constant 0.000000e+00 : f32
    %46 = vector.broadcast %cst_19 : f32 to vector<256x128xf32>
    %47 = arith.select %32, %45, %46 : vector<256x128xi1>, vector<256x128xf32>
    %48 = arith.select %26, %30, %47 : vector<256x128xi1>, vector<256x128xf32>
    %cst_20 = arith.constant 0.000000e+00 : f32
    %49 = vector.broadcast %cst_20 : f32 to vector<256x128xf32>
    %50 = arith.cmpf ogt, %22, %49 : vector<256x128xf32>
    %51 = arith.mulf %48, %23 : vector<256x128xf32>
    %cst_21 = arith.constant 0.000000e+00 : f32
    %52 = vector.broadcast %cst_21 : f32 to vector<256x128xf32>
    %53 = arith.select %50, %51, %52 : vector<256x128xi1>, vector<256x128xf32>
    %c0_22 = arith.constant 0 : index
    %c0_23 = arith.constant 0 : index
    %54 = vector.load %arg6[%c0_22, %c0_23] : memref<8x128xf32, #tpu.memory_space<vmem>>, vector<8x128xf32>
    %c0_24 = arith.constant 0 : index
    %c0_25 = arith.constant 0 : index
    %55 = vector.load %arg4[%c0_24, %c0_25] : memref<8x256xf32, #tpu.memory_space<vmem>>, vector<8x256xf32>
    %cst_26 = arith.constant dense<0.000000e+00> : vector<8x128xf32>
    %56 = tpu.matmul %55, %53, %cst_26 {dimension_numbers = #tpu.dot_dimension_numbers<[1], [0], [0], [1], [0, 0, 1, 1], [], []>, precision = #tpu.contract_precision<fp32>} : vector<8x256xf32>, vector<256x128xf32>, vector<8x128xf32> -> vector<8x128xf32>
    %57 = arith.addf %54, %56 : vector<8x128xf32>
    %c0_27 = arith.constant 0 : index
    %c0_28 = arith.constant 0 : index
    %58 = vector.load %arg6[%c0_27, %c0_28] : memref<8x128xf32, #tpu.memory_space<vmem>>, vector<8x128xf32>
    tpu.vector_store %arg6[%c0_27, %c0_28], %57 {strides = array<i32>} : memref<8x128xf32, #tpu.memory_space<vmem>>, vector<8x128xf32>,
    %c0_i32_29 = arith.constant 0 : i32
    %59 = arith.cmpi eq, %arg1, %c0_i32_29 : i32
    %60 = arith.extui %59 : i1 to i32
    %c0_i32_30 = arith.constant 0 : i32
    %61 = arith.cmpi ne, %60, %c0_i32_30 : i32
    scf.if %61 {
      %c0_31 = arith.constant 0 : index
      %c0_32 = arith.constant 0 : index
      %62 = vector.load %arg6[%c0_31, %c0_32] : memref<8x128xf32, #tpu.memory_space<vmem>>, vector<8x128xf32>
      %63 = vector.extract_strided_slice %62 {offsets = [0, 0], sizes = [3, 128], strides = [1, 1]} : vector<8x128xf32> to vector<3x128xf32>
      %64 = vector.extract_strided_slice %62 {offsets = [3, 0], sizes = [1, 128], strides = [1, 1]} : vector<8x128xf32> to vector<1x128xf32>
      %c0_33 = arith.constant 0 : index
      %c0_34 = arith.constant 0 : index
      %65 = vector.load %arg2[%c0_33, %c0_34] : memref<3x128xf32, #tpu.memory_space<vmem>>, vector<3x128xf32>
      %66 = vector.broadcast %64 : vector<1x128xf32> to vector<3x128xf32>
      %67 = arith.mulf %65, %66 : vector<3x128xf32>
      %68 = arith.subf %67, %63 : vector<3x128xf32>
      %cst_35 = arith.constant 2.000000e+00 : f32
      %69 = vector.broadcast %cst_35 : f32 to vector<3x128xf32>
      %70 = arith.mulf %69, %68 : vector<3x128xf32>
      %c0_36 = arith.constant 0 : index
      %c0_37 = arith.constant 0 : index
      %71 = vector.load %arg5[%c0_36, %c0_37] : memref<3x128xf32, #tpu.memory_space<vmem>>, vector<3x128xf32>
      tpu.vector_store %arg5[%c0_36, %c0_37], %70 {strides = array<i32>} : memref<3x128xf32, #tpu.memory_space<vmem>>, vector<3x128xf32>,
    } else {
    }
    return
  }
  func.func @transform_0(%arg0: i32, %arg1: i32) -> (i32, i32) {
    %c0_i32 = arith.constant 0 : i32
    %c0_i32_0 = arith.constant 0 : i32
    return %c0_i32, %arg0 : i32, i32
  }
  func.func @transform_1(%arg0: i32, %arg1: i32) -> (i32, i32) {
    %c0_i32 = arith.constant 0 : i32
    %c0_i32_0 = arith.constant 0 : i32
    return %arg1, %c0_i32 : i32, i32
  }
  func.func @transform_2(%arg0: i32, %arg1: i32) -> (i32, i32) {
    %c0_i32 = arith.constant 0 : i32
    %c0_i32_0 = arith.constant 0 : i32
    return %c0_i32, %arg1 : i32, i32
  }
  func.func @transform_3(%arg0: i32, %arg1: i32) -> (i32, i32) {
    %c0_i32 = arith.constant 0 : i32
    %c0_i32_0 = arith.constant 0 : i32
    return %c0_i32, %arg0 : i32, i32
  }
}

</mosaic_0001>

<bundles_post_ra>
// kernel: tpu_custom_call.1
= control target key start
LH: loop header
LB: loop body
LE: loop exit
PB: predicated region body
PF: predicated region fallthrough
CT: control target
= control target key end

     0   :  { %8 = vsyncpa [#allocation4], 0  ;;  %s5051_s0 = inlined_call_operand.vmem [shape: f32[3,256], index: 0, kind: input, shape index: {}]   ;;  %s5052_s1 = inlined_call_operand.vmem [shape: f32[256,3], index: 1, kind: input, shape index: {}]   ;;  %s5053_s2 = inlined_call_operand.vmem [shape: f32[8,256], index: 2, kind: input, shape index: {}]   ;;  %s5054_s3 = inlined_call_operand.hbm [shape: f32[3,256], index: 3, kind: output, shape index: {}]  }
   0x1   :  { %10 = vsyncpa [#allocation4 + $0x1], 0  ;;  %s2942_s12 = smov 0   ;;  %s2944_s13 = smov 0  }
   0x2   :  { %s2946_s14 = smov 0   ;;  %s2948_s15 = smov 0  }
   0x3   :  { %s2950_s16 = smov 0   ;;  %s2952_s17 = smov 0  }
   0x4 LB: > { %s2579_s18 = sadd.s32 4294967295, %s2917_s17   ;;  %s2580_s19 = sadd.s32 4294967294, %s2917_s17   ;;  %s2917_s17 = sphi %s2952_s17, %s16_s17   ;;  %s2913_s16 = sphi %s2950_s16, %s5213_s16   ;;  %s2909_s15 = sphi %s2948_s15, %s5212_s15   ;;  %s2905_s14 = sphi %s2946_s14, %s5211_s14   ;;  %s2901_s13 = sphi %s2944_s13, %s5210_s13   ;;  %s2897_s12 = sphi %s2942_s12, %s5209_s12  }
   0x5   : > { %s28_s20 = sadd.s32 1, %s2913_s16  ;;  %s113_s21 = sadd.s32 1, %s2905_s14 }
   0x6   : > { %p30_p0 = scmp.ge.s32.totalorder %s28_s20, 2  ;;  %p123_p1 = scmp.ne.s32.totalorder %s2905_s14, %s2901_s13 }
   0x7   : > { %p124_p2 = scmp.eq.s32.totalorder %s2579_s18, 1  ;;  %p129_p3 = scmp.ne.s32.totalorder %s2901_s13, %s2897_s12 }
   0x8   : > { %s5215_s20 = smov (%p30_p0, %s28_s20), 0  ;;  %p130_p5 = scmp.eq.s32.totalorder %s2580_s19, 1 }
   0x9   : > { %p2982_p4 = por %p124_p2, %p123_p1  ;;  %s110_s23 = ssub.s32 %s2913_s16, %s5215_s20 }
   0xa   : > { %p2585_p6 = scmp.ge.s32.totalorder %s2917_s17, 1  ;;  %p111_p7 = scmp.eq.s32.totalorder %s110_s23, 0 }
   0xb   : > { %p2989_p8 = por %p130_p5, %p129_p3  ;;  %p173_p9 = scmp.lt.s32.totalorder %s2917_s17, 3 }
   0xc   : > { %s2995_s25 = scalar_select %p111_p7, %s2905_s14, %s113_s21  }
   0xd   : > { %p174_p10 = pnand %p2585_p6, %p173_p9 }
   0xf   : > { %177 = sbr.rel (%p174_p10) target bundleno = 740 (0x2e4), region = 32 }
  0x14   : > { %v3000_v0 = vld [vmem:[%s5052_s1 + $0x20] sm:$0xff]  ;;  %v3005_v1 = vld [vmem:[%s5052_s1 + $0x10] sm:$0xff]  ;;  %p206_p11 = scmp.lt.s32.totalorder %s2909_s15, 1  ;;  %v2919_v3 = vmov 0   ;;  %v3025_v4 = vld [vmem:[%s5052_s1 + $0x28] sm:$0xff]  ;;  %v2920_v33 = vmov 1  }
  0x15   : > { %v3010_v2 = vld [vmem:[%s5052_s1] sm:$0xff]  ;;  %2748 = vset.pattern.permute.xlu2 %v2919_v3  ;;  %2747 = vset.pattern.permute.xlu1 %v2919_v3  ;;  %v3030_v5 = vld [vmem:[%s5052_s1 + $0x18] sm:$0xff]  ;;  %v3035_v6 = vld [vmem:[%s5052_s1 + $0x8] sm:$0xff]  ;;  %v5055_v34 = vmov 2   ;;  %s203_s7 = sand.u32 1, %s2901_s13   ;;  %s2685_s10 = sshll.u32 %s2909_s15, 2 }
  0x16   : > { %2746 = vset.pattern.permute.xlu0 %v2919_v3  ;;  %285 = vperm.xlu2 %2748, %v3000_v0   ;;  %s207_s5 = scalar_select %p206_p11, %s2909_s15, 1  ;;  %v3043_v7 = vld [vmem:[%s5052_s1 + $0x40] sm:$0xff]  ;;  %v3048_v8 = vld [vmem:[%s5052_s1 + $0x38] sm:$0xff]  ;;  %v3053_v9 = vld [vmem:[%s5052_s1 + $0x30] sm:$0xff] }
  0x17   : > { %275 = vperm.xlu1 %2747, %v3005_v1   ;;  %265 = vperm.xlu0 %2746, %v3010_v2   ;;  %v3061_v10 = vld [vmem:[%s5052_s1 + $0x58] sm:$0xff]  ;;  %v3066_v11 = vld [vmem:[%s5052_s1 + $0x50] sm:$0xff]  ;;  %v3071_v12 = vld [vmem:[%s5052_s1 + $0x48] sm:$0xff]  ;;  %s2586_s8 = sshll.u32 %s203_s7, 2  ;;  %s2477_s19 = scalar_lea.hbm %s5054_s3, %s2685_s10 }
  0x18   : > { %s2587_s6 = sshll.u32 %s207_s5, 2  ;;  %v3079_v13 = vld [vmem:[%s5052_s1 + $0x70] sm:$0xff]  ;;  %v3084_v14 = vld [vmem:[%s5052_s1 + $0x68] sm:$0xff]  ;;  %v3089_v15 = vld [vmem:[%s5052_s1 + $0x60] sm:$0xff]  ;;  %s205_s21 = scalar_lea.vmem [#allocation3], %s2586_s8 }
  0x19   : > { %s3020_s9 = scalar_lea.vmem %s5051_s0, %s2587_s6  ;;  %v3097_v16 = vld [vmem:[%s5052_s1 + $0x88] sm:$0xff]  ;;  %v3102_v17 = vld [vmem:[%s5052_s1 + $0x80] sm:$0xff]  ;;  %v3107_v18 = vld [vmem:[%s5052_s1 + $0x78] sm:$0xff]  ;;  %s2479_s23 = sshll.u32 %s205_s21, 4  ;;  %s2480_s23 = int_to_ptr.vmem [resolvable:$true] %s2479_s23 }
  0x1a   : > { %v3115_v19 = vld [vmem:[%s5052_s1 + $0xa0] sm:$0xff]  ;;  %v3120_v20 = vld [vmem:[%s5052_s1 + $0x98] sm:$0xff]  ;;  %v3125_v21 = vld [vmem:[%s5052_s1 + $0x90] sm:$0xff]  ;;  %s2481_s26 = sshll.u32 %s2477_s19, 4  ;;  %s2467_s27 = scalar_lea.sflag [#allocation4], %s203_s7  ;;  %s2482_s26 = int_to_ptr.hbm [resolvable:$true] %s2481_s26 }
  0x1b   : > { %v3133_v22 = vld [vmem:[%s5052_s1 + $0xb8] sm:$0xff]  ;;  %v3138_v23 = vld [vmem:[%s5052_s1 + $0xb0] sm:$0xff]  ;;  %v3143_v24 = vld [vmem:[%s5052_s1 + $0xa8] sm:$0xff]  ;;  %s2853_s28 = sshra.s32 %s2482_s26, 4  ;;  %s2859_s30 = scalar_lea.hbm %s5054_s3, 8  ;;  %s2854_s28 = int_to_ptr.hbm [resolvable:$true] %s2853_s28 }
  0x1c   : > { %v3151_v25 = vld [vmem:[%s5052_s1 + $0xd0] sm:$0xff]  ;;  %v3156_v26 = vld [vmem:[%s5052_s1 + $0xc8] sm:$0xff]  ;;  %v3161_v27 = vld [vmem:[%s5052_s1 + $0xc0] sm:$0xff]  ;;  %s2855_s15 = scalar_lea.hbm %s2854_s28, 4  ;;  %p2860_p1 = scmp.lt.s32.totalorder %s2854_s28, %s5054_s3 }
  0x1d   : > { %v3169_v28 = vld [vmem:[%s5052_s1 + $0xe8] sm:$0xff]  ;;  %v3174_v29 = vld [vmem:[%s5052_s1 + $0xe0] sm:$0xff]  ;;  %v3179_v30 = vld [vmem:[%s5052_s1 + $0xd8] sm:$0xff]  ;;  %p2856_p12 = scmp.ne.s32.totalorder %s2854_s28, %s2855_s15  ;;  %p2861_p2 = scmp.lt.s32.totalorder %s2859_s30, %s2855_s15 }
  0x1e   : > { %290 = vperm.xlu2 %2748, %v3025_v4   ;;  %v3187_v31 = vld [vmem:[%s5052_s1 + $0xf8] sm:$0xff]  ;;  %v3192_v32 = vld [vmem:[%s5052_s1 + $0xf0] sm:$0xff]  ;;  %v3279_v59 = vld [vmem:[%s3020_s9] ss:$0 sm:$0xff] }
  0x1f   : > { %280 = vperm.xlu1 %2747, %v3030_v5   ;;  %270 = vperm.xlu0 %2746, %v3035_v6   ;;  %v3282_v60 = vld [vmem:[%s3020_s9 + $0x1] ss:$0 sm:$0xff]  ;;  %p2857_p13 = pnand %p2856_p12, %p2982_p4  ;;  %p2862_p3 = por %p2861_p2, %p2860_p1 }
  0x21   : > { %p2858_p0 = pneg %p2857_p13 }
  0x23   : > { %p2863_p5 = pnand %p2862_p3, %p2858_p0 }
  0x26   : > { %305 = vperm.xlu2 %2748, %v3043_v7  }
  0x27   : > { %300 = vperm.xlu1 %2747, %v3048_v8   ;;  %295 = vperm.xlu0 %2746, %v3053_v9  }
  0x2e   : > { %320 = vperm.xlu2 %2748, %v3061_v10  }
  0x2f   : > { %315 = vperm.xlu1 %2747, %v3066_v11   ;;  %310 = vperm.xlu0 %2746, %v3071_v12  }
  0x36   : > { %335 = vperm.xlu2 %2748, %v3079_v13  }
  0x37   : > { %330 = vperm.xlu1 %2747, %v3084_v14   ;;  %325 = vperm.xlu0 %2746, %v3089_v15  }
  0x3e   : > { %350 = vperm.xlu2 %2748, %v3097_v16  }
  0x3f   : > { %345 = vperm.xlu1 %2747, %v3102_v17   ;;  %340 = vperm.xlu0 %2746, %v3107_v18  }
  0x46   : > { %365 = vperm.xlu2 %2748, %v3115_v19  }
  0x47   : > { %360 = vperm.xlu1 %2747, %v3120_v20   ;;  %355 = vperm.xlu0 %2746, %v3125_v21  }
  0x4e   : > { %380 = vperm.xlu2 %2748, %v3133_v22  }
  0x4f   : > { %375 = vperm.xlu1 %2747, %v3138_v23   ;;  %370 = vperm.xlu0 %2746, %v3143_v24  }
  0x56   : > { %395 = vperm.xlu2 %2748, %v3151_v25  }
  0x57   : > { %390 = vperm.xlu1 %2747, %v3156_v26   ;;  %385 = vperm.xlu0 %2746, %v3161_v27  }
  0x5e   : > { %410 = vperm.xlu2 %2748, %v3169_v28  }
  0x5f   : > { %405 = vperm.xlu1 %2747, %v3174_v29   ;;  %400 = vperm.xlu0 %2746, %v3179_v30  }
  0x66   : > { %2749 = vset.pattern.permute.xlu2 %v2920_v33 }
  0x67   : > { %420 = vperm.xlu1 %2747, %v3187_v31   ;;  %415 = vperm.xlu0 %2746, %v3192_v32  }
  0x68   : > { %457 = vperm.xlu2 %2749, %v3010_v2  }
  0x6f   : > { %2750 = vset.pattern.permute.xlu1 %v2920_v33  ;;  %2753 = vset.pattern.permute.xlu0 %v5055_v34 }
  0x70   : > { %465 = vperm.xlu1 %2750, %v3005_v1   ;;  %469 = vperm.xlu2 %2749, %v3030_v5   ;;  %v3202_v35 = vpop.permute.xlu2 %285 }
  0x71   : > { %670 = vperm.xlu0 %2753, %v3084_v14  }
  0x78   : > { %473 = vperm.xlu1 %2750, %v3000_v0   ;;  %477 = vperm.xlu2 %2749, %v3025_v4   ;;  %v3207_v36 = vpop.permute.xlu2 %290 }
  0x79   : > { %650 = vperm.xlu0 %2753, %v3043_v7  }
  0x80   : > { %485 = vperm.xlu1 %2750, %v3048_v8   ;;  %489 = vperm.xlu2 %2749, %v3043_v7   ;;  %v3212_v37 = vpop.permute.xlu2 %305 }
  0x81   : > { %2754 = vset.pattern.permute.xlu0 %v2920_v33 }
  0x82   : > { %461 = vperm.xlu0 %2754, %v3035_v6  }
  0x88   : > { %497 = vperm.xlu1 %2750, %v3066_v11   ;;  %501 = vperm.xlu2 %2749, %v3061_v10   ;;  %v3218_v38 = vpop.permute.xlu2 %320 }
  0x89   : > { %v3220_v39 = vpop.permute.xlu1 %275  ;;  %v266_v40 = vpop.permute.xlu0 %265 }
  0x8a   : > { %481 = vperm.xlu0 %2754, %v3053_v9   ;;  %v423_v61 = vsub.f32 %v3279_v59, %v266_v40 }
  0x8c   : > { %v777_v7 = vmul.f32 %v423_v61, %v423_v61 }
  0x90   : > { %509 = vperm.xlu1 %2750, %v3084_v14   ;;  %513 = vperm.xlu2 %2749, %v3079_v13   ;;  %v3225_v41 = vpop.permute.xlu2 %335 }
  0x91   : > { %v281_v42 = vpop.permute.xlu1 %280  ;;  %v3227_v43 = vpop.permute.xlu0 %270 }
  0x92   : > { %493 = vperm.xlu0 %2754, %v3071_v12  }
  0x98   : > { %2751 = vset.pattern.permute.xlu1 %v5055_v34  ;;  %2752 = vset.pattern.permute.xlu2 %v5055_v34  ;;  %v3232_v44 = vpop.permute.xlu2 %350 }
  0x99   : > { %678 = vperm.xlu1 %2751, %v3107_v18   ;;  %v3235_v45 = vpop.permute.xlu1 %300  ;;  %674 = vperm.xlu2 %2752, %v3079_v13   ;;  %v3238_v46 = vpop.permute.xlu0 %295 }
  0x9a   : > { %505 = vperm.xlu0 %2754, %v3089_v15  }
  0xa0   : > { %v3241_v47 = vpop.permute.xlu2 %365 }
  0xa1   : > { %666 = vperm.xlu1 %2751, %v3089_v15   ;;  %v3244_v48 = vpop.permute.xlu1 %315  ;;  %662 = vperm.xlu2 %2752, %v3061_v10   ;;  %v3247_v49 = vpop.permute.xlu0 %310  ;;  %v426_v10 = vsub.f32 %v3279_v59, %v281_v42 }
  0xa2   : > { %517 = vperm.xlu0 %2754, %v3107_v18  }
  0xa3   : > { %v780_v14 = vmul.f32 %v426_v10, %v426_v10 }
  0xa8   : > { %v3250_v50 = vpop.permute.xlu2 %380 }
  0xa9   : > { %658 = vperm.xlu1 %2751, %v3066_v11   ;;  %v3253_v51 = vpop.permute.xlu1 %330  ;;  %654 = vperm.xlu2 %2752, %v3071_v12   ;;  %v3256_v52 = vpop.permute.xlu0 %325 }
  0xaa   : > { %581 = vperm.xlu0 %2754, %v3187_v31  }
  0xb0   : > { %v3259_v53 = vpop.permute.xlu2 %395 }
  0xb1   : > { %646 = vperm.xlu1 %2751, %v3048_v8   ;;  %v3262_v54 = vpop.permute.xlu1 %345  ;;  %642 = vperm.xlu2 %2752, %v3053_v9   ;;  %v3265_v55 = vpop.permute.xlu0 %340 }
  0xb2   : > { %573 = vperm.xlu0 %2754, %v3169_v28  }
  0xb8   : > { %v3268_v56 = vpop.permute.xlu2 %410 }
  0xb9   : > { %638 = vperm.xlu1 %2751, %v3025_v4   ;;  %v3271_v57 = vpop.permute.xlu1 %360  ;;  %2755 = vset.pattern.permute.xlu2 %v2920_v33  ;;  %v3274_v58 = vpop.permute.xlu0 %355 }
  0xba   : > { %569 = vperm.xlu0 %2754, %v3174_v29   ;;  %577 = vperm.xlu2 %2755, %v3192_v32  }
  0xc1   : > { %634 = vperm.xlu1 %2751, %v3000_v0   ;;  %v3286_v62 = vpop.permute.xlu1 %375  ;;  %v3288_v63 = vpop.permute.xlu0 %370 }
  0xc2   : > { %565 = vperm.xlu0 %2754, %v3179_v30   ;;  %2756 = vset.pattern.permute.xlu2 %v5055_v34  ;;  %v458_v3 = vpop.permute.xlu2 %457 }
  0xc3   : > { %v584_v4 = vsub.f32 %v3282_v60, %v458_v3  ;;  %742 = vperm.xlu2 %2756, %v3187_v31   ;;  %v428_v31 = vsub.f32 %v3279_v59, %v3207_v36  ;;  %v431_v36 = vsub.f32 %v3279_v59, %v3212_v37  ;;  %v425_v37 = vsub.f32 %v3279_v59, %v3220_v39 }
  0xc5   : > { %v809_v8 = vmul.f32 %v584_v4, %v584_v4 }
  0xc7   : > { %v3294_v9 = vadd.f32 %v809_v8, %v777_v7 }
  0xc9   : > { %5115 = vst [vmem:[#allocation6_spill] sm:$0xff] %v3294_v9  ;;  %630 = vperm.xlu1 %2751, %v3030_v5   ;;  %v3298_v0 = vpop.permute.xlu1 %390  ;;  %v3300_v11 = vpop.permute.xlu0 %385 }
  0xca   : > { %561 = vperm.xlu0 %2754, %v3151_v25   ;;  %v470_v12 = vpop.permute.xlu2 %469 }
  0xcb   : > { %v587_v13 = vsub.f32 %v3282_v60, %v470_v12  ;;  %738 = vperm.xlu2 %2756, %v3192_v32   ;;  %v782_v32 = vmul.f32 %v428_v31, %v428_v31 }
  0xcd   : > { %v812_v15 = vmul.f32 %v587_v13, %v587_v13 }
  0xcf   : > { %v3305_v18 = vadd.f32 %v812_v15, %v780_v14 }
  0xd1   : > { %626 = vperm.xlu1 %2751, %v3005_v1   ;;  %v3310_v5 = vpop.permute.xlu1 %405  ;;  %v3312_v40 = vpop.permute.xlu0 %400 }
  0xd2   : > { %557 = vperm.xlu0 %2754, %v3156_v26   ;;  %v478_v42 = vpop.permute.xlu2 %477 }
  0xd3   : > { %v589_v61 = vsub.f32 %v3282_v60, %v478_v42  ;;  %734 = vperm.xlu2 %2756, %v3169_v28   ;;  %v785_v28 = vmul.f32 %v431_v36, %v431_v36 }
  0xd5   : > { %v814_v3 = vmul.f32 %v589_v61, %v589_v61 }
  0xd7   : > { %v3317_v4 = vadd.f32 %v814_v3, %v782_v32  ;;  %v3341_v32 = vld [vmem:[%s3020_s9 + $0x2] ss:$0 sm:$0xff] }
  0xd9   : > { %v3321_v7 = vpop.permute.xlu1 %420  ;;  %622 = vperm.xlu1 %2751, %v3035_v6   ;;  %v3324_v1 = vpop.permute.xlu0 %415 }
  0xda   : > { %541 = vperm.xlu0 %2754, %v3143_v24   ;;  %v490_v8 = vpop.permute.xlu2 %489 }
  0xdb   : > { %v592_v10 = vsub.f32 %v3282_v60, %v490_v8  ;;  %730 = vperm.xlu2 %2756, %v3174_v29   ;;  %v779_v29 = vmul.f32 %v425_v37, %v425_v37 }
  0xdd   : > { %v817_v12 = vmul.f32 %v592_v10, %v592_v10 }
  0xdf   : > { %v849_v13 = vadd.f32 %v817_v12, %v785_v28 }
  0xe1   : > { %618 = vperm.xlu1 %2751, %v3010_v2   ;;  %v427_v2 = vsub.f32 %v3279_v59, %v3202_v35 }
  0xe2   : > { %2760 = vset.pattern.permute.xlu0 %v5055_v34  ;;  %v466_v6 = vpop.permute.xlu1 %465  ;;  %v502_v14 = vpop.permute.xlu2 %501 }
  0xe3   : > { %v586_v15 = vsub.f32 %v3282_v60, %v466_v6  ;;  %718 = vperm.xlu0 %2760, %v3156_v26   ;;  %v3335_v31 = vpop.permute.xlu0 %670  ;;  %726 = vperm.xlu2 %2756, %v3179_v30   ;;  %v781_v8 = vmul.f32 %v427_v2, %v427_v2  ;;  %v430_v6 = vsub.f32 %v3279_v59, %v3235_v45 }
  0xe5   : > { %v811_v42 = vmul.f32 %v586_v15, %v586_v15 }
  0xe7   : > { %v3338_v61 = vadd.f32 %v811_v42, %v779_v29  ;;  %v424_v42 = vsub.f32 %v3279_v59, %v3227_v43  ;;  %v595_v43 = vsub.f32 %v3282_v60, %v502_v14 }
  0xe9   : > { %722 = vperm.xlu1 %2751, %v3151_v25   ;;  %v437_v25 = vsub.f32 %v3279_v59, %v3225_v41 }
  0xea   : > { %v474_v39 = vpop.permute.xlu1 %473  ;;  %v514_v3 = vpop.permute.xlu2 %513 }
  0xeb   : > { %v588_v36 = vsub.f32 %v3282_v60, %v474_v39  ;;  %698 = vperm.xlu0 %2760, %v3115_v19   ;;  %v651_v26 = vpop.permute.xlu0 %650  ;;  %2757 = vset.pattern.permute.xlu2 %v2920_v33  ;;  %v598_v28 = vsub.f32 %v3282_v60, %v514_v3  ;;  %v791_v41 = vmul.f32 %v437_v25, %v437_v25 }
  0xec   : > { %v753_v30 = vsub.f32 %v3341_v32, %v651_v26  ;;  %553 = vperm.xlu2 %2757, %v3161_v27   ;;  %v784_v3 = vmul.f32 %v430_v6, %v430_v6  ;;  %v434_v25 = vsub.f32 %v3279_v59, %v3218_v38  ;;  %v820_v6 = vmul.f32 %v595_v43, %v595_v43 }
  0xed   : > { %v813_v10 = vmul.f32 %v588_v36, %v588_v36  ;;  %v823_v15 = vmul.f32 %v598_v28, %v598_v28 }
  0xee   : > { %v881_v35 = vmul.f32 %v753_v30, %v753_v30 }
  0xef   : > { %v3352_v12 = vadd.f32 %v813_v10, %v781_v8  ;;  %v855_v30 = vadd.f32 %v823_v15, %v791_v41  ;;  %v778_v10 = vmul.f32 %v424_v42, %v424_v42  ;;  %v788_v15 = vmul.f32 %v434_v25, %v434_v25 }
  0xf0   : > { %v3356_v37 = vadd.f32 %v881_v35, %v849_v13 }
  0xf1   : > { %2758 = vset.pattern.permute.xlu1 %v2920_v33 }
  0xf2   : > { %v486_v29 = vpop.permute.xlu1 %485  ;;  %549 = vperm.xlu1 %2758, %v3133_v22  }
  0xf3   : > { %v591_v2 = vsub.f32 %v3282_v60, %v486_v29  ;;  %2765 = vset.pattern.permute.xlu0 %v2920_v33  ;;  %v675_v39 = vpop.permute.xlu2 %674 }
  0xf4   : > { %v759_v13 = vsub.f32 %v3341_v32, %v675_v39  ;;  %521 = vperm.xlu0 %2765, %v3102_v17   ;;  %v462_v45 = vpop.permute.xlu0 %461  ;;  %2759 = vset.pattern.permute.xlu2 %v5055_v34 }
  0xf5   : > { %v816_v36 = vmul.f32 %v591_v2, %v591_v2  ;;  %v585_v26 = vsub.f32 %v3282_v60, %v462_v45  ;;  %714 = vperm.xlu2 %2759, %v3161_v27   ;;  %v429_v27 = vsub.f32 %v3279_v59, %v3238_v46  ;;  %v436_v46 = vsub.f32 %v3279_v59, %v3253_v51 }
  0xf6   : > { %v887_v8 = vmul.f32 %v759_v13, %v759_v13  ;;  %v852_v13 = vadd.f32 %v820_v6, %v788_v15  ;;  %v433_v51 = vsub.f32 %v3279_v59, %v3244_v48 }
  0xf7   : > { %v3372_v28 = vadd.f32 %v816_v36, %v784_v3  ;;  %v810_v35 = vmul.f32 %v585_v26, %v585_v26  ;;  %v783_v3 = vmul.f32 %v429_v27, %v429_v27 }
  0xf8   : > { %v3376_v29 = vadd.f32 %v887_v8, %v855_v30  ;;  %v758_v30 = vsub.f32 %v3341_v32, %v3335_v31 }
  0xf9   : > { %v3378_v39 = vadd.f32 %v810_v35, %v778_v10  ;;  %v443_v35 = vsub.f32 %v3279_v59, %v3241_v47  ;;  %v446_v47 = vsub.f32 %v3279_v59, %v3250_v50  ;;  %v439_v50 = vsub.f32 %v3279_v59, %v3262_v54 }
  0xfa   : > { %2771 = vrsqrt.f32 %v3376_v29  ;;  %v3381_v2 = vpop.permute.xlu1 %497  ;;  %545 = vperm.xlu1 %2758, %v3138_v23   ;;  %vm1083_vm1 = vweird.f32 %v3376_v29  ;;  %vm1687_vm10 = vcmp.gt.f32.partialorder %v3376_v29, 0.0 }
  0xfb   : > { %v663_v14 = vpop.permute.xlu2 %662 }
  0xfc   : > { %v756_v42 = vsub.f32 %v3341_v32, %v663_v14  ;;  %v482_v41 = vpop.permute.xlu0 %481  ;;  %2767 = vset.pattern.permute.xlu0 %v5055_v34  ;;  %v435_v14 = vsub.f32 %v3279_v59, %v3256_v52  ;;  %v3425_v52 = vmul.f32 %v433_v51, %v433_v51  ;;  %v452_v51 = vsub.f32 %v3279_v59, %v3268_v56 }
  0xfd   : > { %v590_v38 = vsub.f32 %v3282_v60, %v482_v41  ;;  %710 = vperm.xlu2 %2759, %v3133_v22   ;;  %v440_v22 = vsub.f32 %v3279_v59, %v3232_v44  ;;  %v432_v44 = vsub.f32 %v3279_v59, %v3247_v49  ;;  %v886_v41 = vmul.f32 %v758_v30, %v758_v30 }
  0xfe   : > { %v884_v45 = vmul.f32 %v756_v42, %v756_v42  ;;  %v790_v42 = vmul.f32 %v436_v46, %v436_v46  ;;  %v449_v49 = vsub.f32 %v3279_v59, %v3259_v53  ;;  %v3429_v30 = vmul.f32 %v446_v47, %v446_v47 }
  0xff   : > { %v815_v36 = vmul.f32 %v590_v38, %v590_v38  ;;  %v786_v46 = vmul.f32 %v432_v44, %v432_v44  ;;  %v438_v53 = vsub.f32 %v3279_v59, %v3265_v55  ;;  %v445_v56 = vsub.f32 %v3279_v59, %v3286_v62 }
 0x100   : > { %v2772_v26 = vpop.eup %2771  ;;  %v3390_v43 = vadd.f32 %v884_v45, %v852_v13  ;;  %v3416_v13 = vmul.f32 %v440_v22, %v440_v22  ;;  %5118 = vst [vmem:[#allocation9_spill] sm:$0xff] %v3429_v30 }
 0x101   : > { %v1078_v8 = vmul.f32 %v2772_v26, %v3376_v29  ;;  %v3397_v10 = vadd.f32 %v815_v36, %v783_v3  ;;  %vm1084_vm0 = vweird.f32 %v2772_v26 }
 0x102   : > { %2773 = vrsqrt.f32 %v3390_v43  ;;  %v510_v25 = vpop.permute.xlu1 %509  ;;  %2761 = vset.pattern.permute.xlu1 %v5055_v34  ;;  %5116 = vst [vmem:[#allocation7_spill] sm:$0xff] %v3416_v13  ;;  %vm1085_vm2 = vmor %vm1083_vm1, %vm1084_vm0  ;;  %vm1053_vm4 = vweird.f32 %v3390_v43 }
 0x103   : > { %v1079_v6 = vmul.f32 %v2772_v26, %v1078_v8  ;;  %v597_v31 = vsub.f32 %v3282_v60, %v510_v25  ;;  %706 = vperm.xlu1 %2761, %v3138_v23   ;;  %v655_v27 = vpop.permute.xlu2 %654  ;;  %v3418_v23 = vmul.f32 %v443_v35, %v443_v35  ;;  %v3431_v8 = vmul.f32 %v435_v14, %v435_v14 }
 0x104   : > { %v494_v15 = vpop.permute.xlu0 %493  ;;  %v3440_v35 = vmul.f32 %v449_v49, %v449_v49  ;;  %v3442_v25 = vmul.f32 %v439_v50, %v439_v50  ;;  %v3467_v49 = vmul.f32 %v452_v51, %v452_v51  ;;  %v754_v50 = vsub.f32 %v3341_v32, %v655_v27 }
 0x105   : > { %v1080_v38 = vmul.f32 0.5, %v1079_v6  ;;  %v822_v48 = vmul.f32 %v597_v31, %v597_v31  ;;  %2762 = vset.pattern.permute.xlu2 %v2920_v33  ;;  %5117 = vst [vmem:[#allocation8_spill] sm:$0xff] %v3418_v23  ;;  %v442_v6 = vsub.f32 %v3279_v59, %v3271_v57  ;;  %v593_v31 = vsub.f32 %v3282_v60, %v494_v15 }
 0x106   : > { %537 = vperm.xlu2 %2762, %v3115_v19   ;;  %5119 = vst [vmem:[#allocation10_spill] sm:$0xff] %v3442_v25  ;;  %v444_v57 = vsub.f32 %v3279_v59, %v3288_v63  ;;  %v792_v15 = vmul.f32 %v438_v53, %v438_v53  ;;  %v451_v63 = vsub.f32 %v3279_v59, %v3310_v5 }
 0x107   : > { %v854_v45 = vadd.f32 %v822_v48, %v790_v42  ;;  %v1081_v3 = vsub.f32 1.5, %v1080_v38  ;;  %v441_v42 = vsub.f32 %v3279_v59, %v3274_v58  ;;  %v447_v58 = vsub.f32 %v3279_v59, %v3300_v11 }
 0x108   : > { %v3427_v36 = vpop.eup %2773  ;;  %v3484_v11 = vmul.f32 %v444_v57, %v444_v57  ;;  %v450_v27 = vsub.f32 %v3279_v59, %v3312_v40 }
 0x109   : > { %v1048_v54 = vmul.f32 %v3427_v36, %v3390_v43  ;;  %v3437_v22 = vadd.f32 %v886_v41, %v854_v45  ;;  %v1082_v19 = vmul.f32 %v2772_v26, %v1081_v3  ;;  %v3478_v3 = vmul.f32 %v442_v6, %v442_v6 }
 0x10a   : > { %v3480_v53 = vmul.f32 %v441_v42, %v441_v42  ;;  %v3488_v5 = vmul.f32 %v447_v58, %v447_v58  ;;  %v3493_v42 = vmul.f32 %v451_v63, %v451_v63  ;;  %vm1054_vm3 = vweird.f32 %v3427_v36 }
 0x10b   : > { %v1049_v55 = vmul.f32 %v3427_v36, %v1048_v54  ;;  %2775 = vrsqrt.f32 %v3437_v22  ;;  %v679_v44 = vpop.permute.xlu1 %678  ;;  %702 = vperm.xlu1 %2761, %v3143_v24   ;;  %v643_v47 = vpop.permute.xlu2 %642  ;;  %v3452_v14 = vsel %vm1085_vm2, %v2772_v26, %v1082_v19  ;;  %v448_v24 = vsub.f32 %v3279_v59, %v3298_v0  ;;  %5120 = vst [vmem:[#allocation11_spill] sm:$0xff] %v3478_v3  ;;  %vm1055_vm6 = vmor %vm1053_vm4, %vm1054_vm3 }
 0x10c   : > { %v506_v41 = vpop.permute.xlu0 %505  ;;  %v3462_v38 = vmul.f32 %v3452_v14, %v3376_v29  ;;  %v751_v48 = vsub.f32 %v3341_v32, %v643_v47  ;;  %2777 = vrsqrt.f32 %v3356_v37  ;;  %v818_v0 = vmul.f32 %v593_v31, %v593_v31  ;;  %5121 = vst [vmem:[#allocation12_spill] sm:$0xff] %v3480_v53 }
 0x10d   : > { %v1050_v26 = vmul.f32 0.5, %v1049_v55  ;;  %v596_v62 = vsub.f32 %v3282_v60, %v506_v41  ;;  %v3482_v54 = vmul.f32 %v445_v56, %v445_v56  ;;  %v3486_v51 = vmul.f32 %v448_v24, %v448_v24 }
 0x10e   : > { %533 = vperm.xlu2 %2762, %v3120_v20   ;;  %v1431_v45 = vmul.f32 2.0, %v3462_v38  ;;  %v879_v55 = vmul.f32 %v751_v48, %v751_v48  ;;  %v882_v56 = vmul.f32 %v754_v50, %v754_v50  ;;  %v850_v34 = vadd.f32 %v818_v0, %v786_v46 }
 0x10f   : > { %5122 = vst [vmem:[#allocation13_spill] sm:$0xff] %v3482_v54  ;;  %v1051_v41 = vsub.f32 1.5, %v1050_v26  ;;  %v821_v31 = vmul.f32 %v596_v62, %v596_v62  ;;  %v760_v26 = vsub.f32 %v3341_v32, %v679_v44  ;;  %v594_v44 = vsub.f32 %v3282_v60, %v3381_v2 }
 0x110   : > { %v2634_v47 = vadd.f32 -1.0, %v1431_v45  ;;  %v3503_v62 = vadd.f32 %v879_v55, %v3397_v10  ;;  %v3513_v53 = vadd.f32 %v882_v56, %v850_v34  ;;  %vm1073_vm7 = vweird.f32 %v3437_v22 }
 0x111   : > { %v2776_v19 = vpop.eup %2775  ;;  %v1052_v63 = vmul.f32 %v3427_v36, %v1051_v41  ;;  %v853_v50 = vadd.f32 %v821_v31, %v3431_v8  ;;  %v888_v55 = vmul.f32 %v760_v26, %v760_v26  ;;  %v819_v56 = vmul.f32 %v594_v44, %v594_v44 }
 0x112   : > { %v1068_v6 = vmul.f32 %v2776_v19, %v3437_v22  ;;  %v2666_v24 = vadd.f32 -0.3, %v2634_v47  ;;  %v3496_v13 = vpop.eup %2777  ;;  %5123 = vst [vmem:[#allocation14_spill] sm:$0xff] %v3503_v62  ;;  %v5124_v47 = vmov 2   ;;  %vm1074_vm5 = vweird.f32 %v2776_v19 }
 0x113   : > { %v667_v57 = vpop.permute.xlu1 %666  ;;  %2763 = vset.pattern.permute.xlu1 %v2920_v33  ;;  %2779 = vrsqrt.f32 %v3503_v62  ;;  %v3523_v34 = vsel %vm1055_vm6, %v3427_v36, %v1052_v63  ;;  %v454_v26 = vsub.f32 %v3279_v59, %v3321_v7  ;;  %vm1075_vm8 = vmor %vm1073_vm7, %vm1074_vm5  ;;  %v851_v63 = vadd.f32 %v819_v56, %v3425_v52 }
 0x114   : > { %v757_v48 = vsub.f32 %v3341_v32, %v667_v57  ;;  %v518_v58 = vpop.permute.xlu0 %517  ;;  %529 = vperm.xlu1 %2763, %v3125_v21   ;;  %v578_v40 = vpop.permute.xlu2 %577  ;;  %v1069_v45 = vmul.f32 %v2776_v19, %v1068_v6  ;;  %v1527_v33 = vand.u32 2147483647, %v2666_v24  ;;  %v1018_v6 = vmul.f32 %v3496_v13, %v3356_v37 }
 0x115   : > { %v599_v46 = vsub.f32 %v3282_v60, %v518_v58  ;;  %v3527_v24 = vmul.f32 %v450_v27, %v450_v27  ;;  %v3543_v7 = vmul.f32 %v3523_v34, %v3390_v43  ;;  %vm1399_vm9 = vcmp.lt.f32.partialorder %v3462_v38, 1.0 }
 0x116   : > { %v885_v0 = vmul.f32 %v757_v48, %v757_v48  ;;  %2764 = vset.pattern.permute.xlu2 %v5124_v47  ;;  %v1070_v57 = vmul.f32 0.5, %v1069_v45  ;;  %v1559_v31 = vmul.f32 1.4285715, %v1527_v33  ;;  %v453_v48 = vsub.f32 %v3279_v59, %v3324_v1 }
 0x117   : > { %v824_v10 = vmul.f32 %v599_v46, %v599_v46  ;;  %694 = vperm.xlu2 %2764, %v3120_v20   ;;  %v1019_v59 = vmul.f32 %v3496_v13, %v1018_v6  ;;  %vm1303_vm11 = vcmp.lt.f32.partialorder %v3462_v38, 0.3  ;;  %vm1396_vm4 = vcmp.lt.f32.partialorder %v3543_v7, 1.0 }
 0x118   : > { %v3517_v41 = vadd.f32 %v885_v0, %v853_v50  ;;  %v1071_v2 = vsub.f32 1.5, %v1070_v57  ;;  %v1591_v33 = vsub.f32 1.0, %v1559_v31  ;;  %v808_v57 = vmul.f32 %v454_v26, %v454_v26 }
 0x119   : > { %v856_v8 = vadd.f32 %v824_v10, %v792_v15  ;;  %v3551_v0 = vpop.eup %2779  ;;  %v614_v10 = vsub.f32 %v3282_v60, %v578_v40  ;;  %v807_v52 = vmul.f32 %v453_v48, %v453_v48  ;;  %v1428_v31 = vmul.f32 2.0, %v3543_v7 }
 0x11a   : > { %2781 = vrsqrt.f32 %v3517_v41  ;;  %v1072_v20 = vmul.f32 %v2776_v19, %v1071_v2  ;;  %5125 = vst [vmem:[#allocation15_spill] sm:$0xff] %v3551_v0  ;;  %v1623_v26 = vsel %vm1399_vm9, %v1591_v33, 0.0  ;;  %vm1063_vm12 = vweird.f32 %v3517_v41 }
 0x11b   : > { %v3533_v58 = vadd.f32 %v888_v55, %v856_v8  ;;  %v659_v15 = vpop.permute.xlu1 %658  ;;  %2783 = vrsqrt.f32 %v3513_v53  ;;  %v2631_v3 = vadd.f32 -1.0, %v1428_v31  ;;  %vm1686_vm5 = vcmp.gt.f32.partialorder %v3437_v22, 0.0 }
 0x11c   : > { %v755_v36 = vsub.f32 %v3341_v32, %v659_v15  ;;  %v582_v45 = vpop.permute.xlu0 %581  ;;  %525 = vperm.xlu1 %2763, %v3097_v16   ;;  %v3539_v27 = vsel %vm1075_vm8, %v2776_v19, %v1072_v20  ;;  %v1335_v19 = vmul.f32 3.3333333, %v3462_v38  ;;  %v3569_v15 = vmul.f32 0.5, %v1019_v59 }
 0x11d   : > { %2785 = vrsqrt.f32 %v3533_v58  ;;  %v615_v1 = vsub.f32 %v3282_v60, %v582_v45  ;;  %v743_v46 = vpop.permute.xlu2 %742  ;;  %v3557_v6 = vmul.f32 %v3539_v27, %v3437_v22  ;;  %v1332_v45 = vmul.f32 3.3333333, %v3543_v7 }
 0x11e   : > { %v883_v44 = vmul.f32 %v755_v36, %v755_v36  ;;  %v776_v50 = vsub.f32 %v3341_v32, %v743_v46  ;;  %v2602_v36 = vadd.f32 -1.0, %v1335_v19  ;;  %v998_v46 = vmul.f32 %v3551_v0, %v3503_v62 }
 0x11f   : > { %v840_v55 = vmul.f32 %v615_v1, %v615_v1  ;;  %690 = vperm.xlu2 %2764, %v3125_v21   ;;  %v1430_v48 = vmul.f32 2.0, %v3557_v6  ;;  %v3587_v23 = vadd.f32 -1.0, %v1332_v45  ;;  %vm1093_vm13 = vweird.f32 %v3533_v58 }
 0x120   : > { %v3559_v2 = vpop.eup %2781  ;;  %v3561_v8 = vadd.f32 %v883_v44, %v851_v63  ;;  %v904_v20 = vmul.f32 %v776_v50, %v776_v50  ;;  %v839_v44 = vmul.f32 %v614_v10, %v614_v10  ;;  %vm1302_vm2 = vcmp.lt.f32.partialorder %v3557_v6, 0.3 }
 0x121   : > { %v1058_v56 = vmul.f32 %v3559_v2, %v3517_v41  ;;  %v872_v40 = vadd.f32 %v840_v55, %v808_v57  ;;  %v3567_v21 = vpop.eup %2783  ;;  %v1655_v57 = vsel %vm1303_vm11, %v2602_v36, %v1623_v26  ;;  %v2633_v10 = vadd.f32 -1.0, %v1430_v48 }
 0x122   : > { %2787 = vrsqrt.f32 %v3561_v8  ;;  %v1028_v38 = vmul.f32 %v3567_v21, %v3513_v53  ;;  %vm1064_vm15 = vweird.f32 %v3559_v2  ;;  %vm1398_vm3 = vcmp.lt.f32.partialorder %v3557_v6, 1.0 }
 0x123   : > { %v2786_v1 = vpop.eup %2785  ;;  %v1059_v63 = vmul.f32 %v3559_v2, %v1058_v56  ;;  %v647_v50 = vpop.permute.xlu1 %646  ;;  %v3582_v54 = vadd.f32 %v904_v20, %v872_v40  ;;  %v2665_v40 = vadd.f32 -0.3, %v2633_v10  ;;  %vm1065_vm1 = vmor %vm1063_vm12, %vm1064_vm15  ;;  %vm1300_vm6 = vcmp.lt.f32.partialorder %v3543_v7, 0.3 }
 0x124   : > { %v1088_v59 = vmul.f32 %v2786_v1, %v3533_v58  ;;  %v752_v33 = vsub.f32 %v3341_v32, %v647_v50  ;;  %v574_v19 = vpop.permute.xlu0 %573  ;;  %2766 = vset.pattern.permute.xlu1 %v5124_v47  ;;  %v871_v50 = vadd.f32 %v839_v44, %v807_v52  ;;  %v1719_v47 = vmul.f32 %v1655_v57, %v3452_v14 }
 0x125   : > { %v1060_v55 = vmul.f32 0.5, %v1059_v63  ;;  %5126 = vst [vmem:[#allocation16_spill] sm:$0xff] %v3582_v54  ;;  %686 = vperm.xlu1 %2766, %v3097_v16   ;;  %v739_v56 = vpop.permute.xlu2 %738  ;;  %v999_v16 = vmul.f32 %v3551_v0, %v998_v46  ;;  %2789 = vrsqrt.f32 %v3582_v54  ;;  %v1526_v36 = vand.u32 2147483647, %v2665_v40 }
 0x126   : > { %v880_v25 = vmul.f32 %v752_v33, %v752_v33  ;;  %v1089_v30 = vmul.f32 %v2786_v1, %v1088_v59  ;;  %v775_v9 = vsub.f32 %v3341_v32, %v739_v56  ;;  %v2663_v52 = vadd.f32 -0.3, %v2631_v3 }
 0x127   : > { %682 = vperm.xlu2 %2764, %v3102_v17   ;;  %v1061_v26 = vsub.f32 1.5, %v1060_v55  ;;  %vm1094_vm14 = vweird.f32 %v2786_v1  ;;  %v1029_v17 = vmul.f32 %v3567_v21, %v1028_v38  ;;  %v1751_v63 = vsel %vm1687_vm10, %v1719_v47, 0.0 }
 0x128   : > { %v1090_v20 = vmul.f32 0.5, %v1089_v30  ;;  %v3596_v31 = vadd.f32 %v880_v25, %v3372_v28  ;;  %v3598_v48 = vpop.eup %2787  ;;  %v613_v30 = vsub.f32 %v3282_v60, %v574_v19  ;;  %v903_v14 = vmul.f32 %v775_v9, %v775_v9  ;;  %vm1095_vm0 = vmor %vm1093_vm13, %vm1094_vm14 }
 0x129   : > { %v1558_v44 = vmul.f32 1.4285715, %v1526_v36  ;;  %v1062_v59 = vmul.f32 %v3559_v2, %v1061_v26  ;;  %v3608_v33 = vmul.f32 0.5, %v999_v16  ;;  %v1038_v57 = vmul.f32 %v3598_v48, %v3561_v8 }
 0x12a   : > { %v1091_v45 = vsub.f32 1.5, %v1090_v20  ;;  %2791 = vrsqrt.f32 %v3596_v31  ;;  %v1524_v29 = vand.u32 2147483647, %v2663_v52  ;;  %v3619_v56 = vand.u32 4294901760, %v1751_v63 }
 0x12b   : > { %v639_v46 = vpop.permute.xlu1 %638  ;;  %v3621_v10 = vmul.f32 0.5, %v1029_v17  ;;  %v3623_v38 = vpop.eup %2789  ;;  %v838_v47 = vmul.f32 %v613_v30, %v613_v30  ;;  %v3625_v40 = vadd.f32 %v903_v14, %v871_v50  ;;  %v1590_v26 = vsub.f32 1.0, %v1558_v44 }
 0x12c   : > { %v750_v28 = vsub.f32 %v3341_v32, %v639_v46  ;;  %v570_v25 = vpop.permute.xlu0 %569  ;;  %v1092_v3 = vmul.f32 %v2786_v1, %v1091_v45  ;;  %5127 = vst [vmem:[#allocation17_spill] sm:$0xff] %v3619_v56  ;;  %v3638_v36 = vsel %vm1065_vm1, %v3559_v2, %v1062_v59  ;;  %v1039_v50 = vmul.f32 %v3598_v48, %v1038_v57 }
 0x12d   : > { %v735_v9 = vpop.permute.xlu2 %734  ;;  %5128 = vst [vmem:[#allocation18_spill] sm:$0xff] %v3623_v38  ;;  %v612_v16 = vsub.f32 %v3282_v60, %v570_v25  ;;  %v1334_v52 = vmul.f32 3.3333333, %v3557_v6  ;;  %v1556_v45 = vmul.f32 1.4285715, %v1524_v29  ;;  %v1248_v17 = vmul.f32 %v3623_v38, %v3582_v54 }
 0x12e   : > { %v774_v19 = vsub.f32 %v3341_v32, %v735_v9  ;;  %v3617_v55 = vsel %vm1095_vm0, %v2786_v1, %v1092_v3  ;;  %v878_v1 = vmul.f32 %v750_v28, %v750_v28  ;;  %v3647_v46 = vsub.f32 %v1751_v63, %v3619_v56 }
 0x12f   : > { %v3630_v20 = vmul.f32 %v3617_v55, %v3533_v58  ;;  %v870_v28 = vadd.f32 %v838_v47, %v3467_v49  ;;  %2793 = vrsqrt.f32 %v3625_v40  ;;  %v837_v25 = vmul.f32 %v612_v16, %v612_v16 }
 0x130   : > { %v902_v30 = vmul.f32 %v774_v19, %v774_v19  ;;  %v3650_v2 = vpop.eup %2791  ;;  %v3656_v44 = vmul.f32 %v3638_v36, %v3517_v41  ;;  %v3659_v59 = vadd.f32 %v878_v1, %v3317_v4  ;;  %v1622_v29 = vsel %vm1398_vm3, %v1590_v26, 0.0 }
 0x131   : > { %v1432_v14 = vmul.f32 2.0, %v3630_v20  ;;  %v1040_v19 = vmul.f32 0.5, %v1039_v50  ;;  %v2601_v47 = vadd.f32 -1.0, %v1334_v52  ;;  %v1588_v16 = vsub.f32 1.0, %v1556_v45 }
 0x132   : > { %vm1044_vm7 = vweird.f32 %v3598_v48  ;;  %v3668_v4 = vmul.f32 %v3623_v38, %v1248_v17  ;;  %v1008_v1 = vmul.f32 %v3650_v2, %v3596_v31  ;;  %v869_v26 = vadd.f32 %v837_v25, %v3493_v42 }
 0x133   : > { %v635_v3 = vpop.permute.xlu1 %634  ;;  %v2635_v9 = vadd.f32 -1.0, %v1432_v14  ;;  %v3672_v14 = vadd.f32 %v902_v30, %v870_v28  ;;  %v1654_v50 = vsel %vm1302_vm2, %v2601_v47, %v1622_v29  ;;  %v1333_v52 = vmul.f32 3.3333333, %v3656_v44 }
 0x134   : > { %v749_v63 = vsub.f32 %v3341_v32, %v635_v3  ;;  %v566_v57 = vpop.permute.xlu0 %565  ;;  %5129 = vst [vmem:[#allocation19_spill] sm:$0xff] %v3668_v4  ;;  %v1429_v45 = vmul.f32 2.0, %v3656_v44  ;;  %vm1043_vm8 = vweird.f32 %v3561_v8  ;;  %2795 = vrsqrt.f32 %v3659_v59 }
 0x135   : > { %v731_v49 = vpop.permute.xlu2 %730  ;;  %v2667_v3 = vadd.f32 -0.3, %v2635_v9  ;;  %v3682_v30 = vpop.eup %2793  ;;  %vm1304_vm9 = vcmp.lt.f32.partialorder %v3630_v20, 0.3  ;;  %v1336_v42 = vmul.f32 3.3333333, %v3630_v20  ;;  %v1009_v28 = vmul.f32 %v3650_v2, %v1008_v1  ;;  %vm1045_vm15 = vmor %vm1043_vm8, %vm1044_vm7 }
 0x136   : > { %v877_v17 = vmul.f32 %v749_v63, %v749_v63  ;;  %v773_v54 = vsub.f32 %v3341_v32, %v731_v49  ;;  %vm1400_vm10 = vcmp.lt.f32.partialorder %v3630_v20, 1.0  ;;  %vm1688_vm11 = vcmp.gt.f32.partialorder %v3533_v58, 0.0 }
 0x137   : > { %v1528_v38 = vand.u32 2147483647, %v2667_v3  ;;  %v2632_v6 = vadd.f32 -1.0, %v1429_v45  ;;  %2797 = vrsqrt.f32 %v3672_v14  ;;  %v1718_v63 = vmul.f32 %v1654_v50, %v3539_v27 }
 0x138   : > { %v611_v9 = vsub.f32 %v3282_v60, %v566_v57  ;;  %vm1301_vm12 = vcmp.lt.f32.partialorder %v3656_v44, 0.3  ;;  %v1620_v47 = vsel %vm1396_vm4, %v1588_v16, 0.0  ;;  %v1041_v3 = vsub.f32 1.5, %v1040_v19 }
 0x139   : > { %v1560_v25 = vmul.f32 1.4285715, %v1528_v38  ;;  %v2664_v49 = vadd.f32 -0.3, %v2632_v6  ;;  %v3696_v4 = vadd.f32 %v877_v17, %v3352_v12  ;;  %v901_v45 = vmul.f32 %v773_v54, %v773_v54 }
 0x13a   : > { %v1238_v27 = vmul.f32 %v3682_v30, %v3625_v40  ;;  %v2603_v57 = vadd.f32 -1.0, %v1336_v42  ;;  %v2600_v50 = vadd.f32 -1.0, %v1333_v52  ;;  %vm1684_vm13 = vcmp.gt.f32.partialorder %v3390_v43, 0.0  ;;  %v3702_v6 = vpop.eup %2795 }
 0x13b   : > { %v631_v29 = vpop.permute.xlu1 %630  ;;  %v1592_v62 = vsub.f32 1.0, %v1560_v25  ;;  %v1525_v0 = vand.u32 2147483647, %v2664_v49  ;;  %v1750_v54 = vsel %vm1686_vm5, %v1718_v63, 0.0  ;;  %v1652_v17 = vsel %vm1300_vm6, %v3587_v23, %v1620_v47 }
 0x13c   : > { %v748_v1 = vsub.f32 %v3341_v32, %v631_v29  ;;  %v562_v19 = vpop.permute.xlu0 %561  ;;  %vm1685_vm14 = vcmp.gt.f32.partialorder %v3517_v41, 0.0  ;;  %v1042_v29 = vmul.f32 %v3598_v48, %v1041_v3  ;;  %2799 = vrsqrt.f32 %v3696_v4 }
 0x13d   : > { %v727_v38 = vpop.permute.xlu2 %726  ;;  %v1624_v12 = vsel %vm1400_vm10, %v1592_v62, 0.0  ;;  %v1557_v25 = vmul.f32 1.4285715, %v1525_v0  ;;  %v3716_v49 = vpop.eup %2797  ;;  %v836_v22 = vmul.f32 %v611_v9, %v611_v9  ;;  %v3719_v62 = vadd.f32 %v901_v45, %v869_v26 }
 0x13e   : > { %v876_v16 = vmul.f32 %v748_v1, %v748_v1  ;;  %v772_v42 = vsub.f32 %v3341_v32, %v727_v38  ;;  %v1656_v52 = vsel %vm1304_vm9, %v2603_v57, %v1624_v12  ;;  %v988_v23 = vmul.f32 %v3702_v6, %v3659_v59 }
 0x13f   : > { %v1720_v7 = vmul.f32 %v1656_v52, %v3617_v55  ;;  %vm1397_vm0 = vcmp.lt.f32.partialorder %v3656_v44, 1.0  ;;  %v1589_v0 = vsub.f32 1.0, %v1557_v25  ;;  %v3730_v20 = vsel %vm1045_vm15, %v3598_v48, %v1042_v29 }
 0x140   : > { %v3733_v63 = vadd.f32 %v876_v16, %v3305_v18  ;;  %v610_v26 = vsub.f32 %v3282_v60, %v562_v19  ;;  %v1716_v9 = vmul.f32 %v1652_v17, %v3523_v34  ;;  %v900_v47 = vmul.f32 %v772_v42, %v772_v42 }
 0x141   : > { %v1752_v55 = vsel %vm1688_vm11, %v1720_v7, 0.0  ;;  %v1621_v45 = vsel %vm1397_vm0, %v1589_v0, 0.0  ;;  %v3743_v1 = vmul.f32 %v3730_v20, %v3561_v8  ;;  %v868_v48 = vadd.f32 %v836_v22, %v3527_v24 }
 0x142   : > { %v3739_v3 = vand.u32 4294901760, %v1752_v55  ;;  %2801 = vrsqrt.f32 %v3719_v62  ;;  %v3747_v18 = vand.u32 4294901760, %v1750_v54  ;;  %v1653_v58 = vsel %vm1301_vm12, %v2600_v50, %v1621_v45  ;;  %v3761_v19 = vpop.eup %2799 }
 0x143   : > { %v3751_v38 = vmul.f32 0.5, %v1009_v28  ;;  %v989_v34 = vmul.f32 %v3702_v6, %v988_v23  ;;  %v1228_v57 = vmul.f32 %v3716_v49, %v3672_v14  ;;  %v627_v16 = vpop.permute.xlu1 %626  ;;  %v3764_v44 = vmul.f32 %v3682_v30, %v1238_v27 }
 0x144   : > { %5130 = vst [vmem:[#allocation20_spill] sm:$0xff] %v3739_v3  ;;  %1773 = vmatpush.msra.mxu0 %v3739_v3  ;;  %1969 = vmatpush.msra.mxu3 %v3739_v3  ;;  %v3759_v24 = vsub.f32 %v1752_v55, %v3739_v3  ;;  %v835_v28 = vmul.f32 %v610_v26, %v610_v26  ;;  %v1748_v12 = vsel %vm1684_vm13, %v1716_v9, 0.0  ;;  %2803 = vrsqrt.f32 %v3733_v63 }
 0x145   : > { %5131 = vst [vmem:[#allocation21_spill] sm:$0xff] %v3747_v18  ;;  %v1717_v50 = vmul.f32 %v1653_v58, %v3638_v36  ;;  %v3770_v17 = vadd.f32 %v900_v47, %v868_v48  ;;  %v1427_v52 = vmul.f32 2.0, %v3743_v1  ;;  %vm1033_vm1 = vweird.f32 %v3513_v53  ;;  %v558_v36 = vpop.permute.xlu0 %557 }
 0x146   : > { %1775 = vmatpush.msra.mxu0 %v3619_v56  ;;  %1916 = vmatpush.msra.mxu2 %v3759_v24  ;;  %v5066_v42 = vand.u32 4294901760, %v3759_v24  ;;  %v747_v27 = vsub.f32 %v3341_v32, %v627_v16  ;;  %v554_v43 = vpop.permute.xlu2 %553  ;;  %v3782_v29 = vsub.f32 %v1750_v54, %v3747_v18  ;;  %v5065_v22 = vand.u32 4294901760, %v3647_v46 }
 0x147   : > { %5132 = vst [vmem:[#allocation22_spill] sm:$0xff] %v3770_v17  ;;  %1971 = vmatpush.msra.mxu3 %v3619_v56  ;;  %v1749_v25 = vsel %vm1685_vm14, %v1717_v50, 0.0  ;;  %v3785_v7 = vmul.f32 0.5, %v989_v34  ;;  %v3788_v23 = vmul.f32 %v3716_v49, %v1228_v57  ;;  %v978_v0 = vmul.f32 %v3761_v19, %v3696_v4 }
 0x148   : > { %1777 = vmatpush.msra.mxu0 %v3747_v18  ;;  %1919 = vmatpush.msra.mxu2 %v3647_v46  ;;  %v3794_v26 = vand.u32 4294901760, %v1749_v25  ;;  %v3796_v41 = vpop.eup %2801  ;;  %v3799_v54 = vand.u32 4294901760, %v1748_v12  ;;  %v1816_v55 = vsub.f32 %v3759_v24, %v5066_v42  ;;  %v2630_v9 = vadd.f32 -1.0, %v1427_v52 }
 0x149   : > { %1973 = vmatpush.msra.mxu3 %v3747_v18  ;;  %v1822_v47 = vsub.f32 %v3647_v46, %v5065_v22  ;;  %v3808_v45 = vadd.f32 %v835_v28, %v3440_v35  ;;  %2805 = vrsqrt.f32 %v3770_v17  ;;  %v609_v48 = vsub.f32 %v3282_v60, %v558_v36 }
 0x14a   : > { %5133 = vst [vmem:[#allocation23_spill] sm:$0xff] %v3794_v26  ;;  %1779 = vmatpush.msra.mxu0 %v3794_v26  ;;  %1922 = vmatpush.msra.mxu2 %v3782_v29  ;;  %v1031_v58 = vsub.f32 1.5, %v3621_v10  ;;  %v875_v34 = vmul.f32 %v747_v27, %v747_v27  ;;  %v1817_v57 = vand.u32 4294901760, %v1816_v55  ;;  %v3817_v16 = vsub.f32 %v1749_v25, %v3794_v26  ;;  %v3819_v28 = vpop.eup %2803  ;;  %v3833_v55 = vld [vmem:[%s3020_s9 + $0x1] ss:$0 sm:$0xff] }
 0x14b   : > { %5134 = vst [vmem:[#allocation24_spill] sm:$0xff] %v3799_v54  ;;  %1975 = vmatpush.msra.mxu3 %v3794_v26  ;;  %v2662_v35 = vadd.f32 -0.3, %v2630_v9  ;;  %v979_v50 = vmul.f32 %v3761_v19, %v978_v0  ;;  %v1218_v60 = vmul.f32 %v3796_v41, %v3719_v62  ;;  %vm1299_vm2 = vcmp.lt.f32.partialorder %v3743_v1, 0.3 }
 0x14c   : > { %1781 = vmatpush.msra.mxu0 %v3799_v54  ;;  %v1331_v10 = vmul.f32 3.3333333, %v3743_v1  ;;  %1818 = vmatpush.msra.mxu1 %v1817_v57  ;;  %v1823_v27 = vand.u32 4294901760, %v1822_v47  ;;  %v3829_v36 = vsub.f32 %v1748_v12, %v3799_v54  ;;  %v1032_v25 = vmul.f32 %v3567_v21, %v1031_v58  ;;  %v623_v58 = vpop.permute.xlu1 %622 }
 0x14d   : > { %1925 = vmatpush.msra.mxu2 %v3817_v16  ;;  %v1523_v52 = vand.u32 2147483647, %v2662_v35  ;;  %v834_v0 = vmul.f32 %v609_v48, %v609_v48  ;;  %v608_v9 = vsub.f32 %v3833_v55, %v554_v43  ;;  %1977 = vmatpush.msra.mxu3 %v3799_v54  ;;  %vm1683_vm3 = vcmp.gt.f32.partialorder %v3561_v8, 0.0 }
 0x14e   : > { %5135 = vst [vmem:[#allocation25_spill] sm:$0xff] %v3829_v36  ;;  %vm1034_vm4 = vweird.f32 %v3567_v21  ;;  %v5070_v57 = vand.u32 4294901760, %v3782_v29  ;;  %v968_v47 = vmul.f32 %v3819_v28, %v3733_v63  ;;  %v3843_v12 = vadd.f32 %v875_v34, %v3338_v61  ;;  %1824 = vmatpush.msra.mxu1 %v1823_v27 }
 0x14f   : > { %v1555_v48 = vmul.f32 1.4285715, %v1523_v52  ;;  %1928 = vmatpush.msra.mxu2 %v3829_v36  ;;  %vm1035_vm5 = vmor %vm1033_vm1, %vm1034_vm4  ;;  %v1021_v43 = vsub.f32 1.5, %v3569_v15  ;;  %v3849_v35 = vpop.eup %2805  ;;  %v3851_v22 = vmul.f32 0.5, %v979_v50  ;;  %v3854_v42 = vmul.f32 %v3796_v41, %v1218_v60  ;;  %v715_v54 = vpop.permute.xlu2 %714 }
 0x150   : > { %v3857_v61 = vsel %vm1035_vm5, %v3567_v21, %v1032_v25  ;;  %v1828_v34 = vsub.f32 %v3782_v29, %v5070_v57  ;;  %v2598_v52 = vadd.f32 -1.0, %v1331_v10  ;;  %vm1395_vm6 = vcmp.lt.f32.partialorder %v3743_v1, 1.0  ;;  %v542_v25 = vpop.permute.xlu0 %541 }
 0x151   : > { %v1587_v27 = vsub.f32 1.0, %v1555_v48  ;;  %v3865_v15 = vmul.f32 %v3857_v61, %v3513_v53  ;;  %v3868_v50 = vadd.f32 %v834_v0, %v3486_v51  ;;  %v833_v60 = vmul.f32 %v608_v9, %v608_v9 }
 0x152   : > { %v746_v21 = vsub.f32 %v3341_v32, %v623_v58  ;;  %v1829_v26 = vand.u32 4294901760, %v1828_v34  ;;  %v969_v18 = vmul.f32 %v3819_v28, %v968_v47  ;;  %2807 = vrsqrt.f32 %v3843_v12 }
 0x153   : > { %v1619_v10 = vsel %vm1395_vm6, %v1587_v27, 0.0  ;;  %v1022_v48 = vmul.f32 %v3496_v13, %v1021_v43  ;;  %v1208_v57 = vmul.f32 %v3849_v35, %v3770_v17  ;;  %v769_v51 = vsub.f32 %v3341_v32, %v715_v54 }
 0x154   : > { %v1651_v56 = vsel %vm1299_vm2, %v2598_v52, %v1619_v10  ;;  %v1426_v0 = vmul.f32 2.0, %v3865_v15  ;;  %1830 = vmatpush.msra.mxu1 %v1829_v26  ;;  %v605_v9 = vsub.f32 %v3833_v55, %v542_v25  ;;  %vm1023_vm7 = vweird.f32 %v3356_v37 }
 0x155   : > { %v1715_v47 = vmul.f32 %v1651_v56, %v3730_v20  ;;  %vm1024_vm8 = vweird.f32 %v3496_v13  ;;  %v865_v58 = vadd.f32 %v833_v60, %v3488_v5  ;;  %v874_v43 = vmul.f32 %v746_v21, %v746_v21 }
 0x156   : > { %v2629_v34 = vadd.f32 -1.0, %v1426_v0  ;;  %vm1025_vm9 = vmor %vm1023_vm7, %vm1024_vm8  ;;  %v5072_v1 = vand.u32 4294901760, %v3817_v16  ;;  %v3886_v52 = vmul.f32 0.5, %v969_v18  ;;  %v1011_v56 = vsub.f32 1.5, %v3751_v38 }
 0x157   : > { %v1747_v32 = vsel %vm1683_vm3, %v1715_v47, 0.0  ;;  %v3891_v26 = vsel %vm1025_vm9, %v3496_v13, %v1022_v48  ;;  %v897_v54 = vmul.f32 %v769_v51, %v769_v51  ;;  %v830_v18 = vmul.f32 %v605_v9, %v605_v9  ;;  %v619_v48 = vpop.permute.xlu1 %618 }
 0x158   : > { %v3894_v20 = vand.u32 4294901760, %v1747_v32  ;;  %v2661_v27 = vadd.f32 -0.3, %v2629_v34  ;;  %v3898_v5 = vmul.f32 %v3891_v26, %v3356_v37  ;;  %v3900_v60 = vpop.eup %2807  ;;  %v1834_v8 = vsub.f32 %v3817_v16, %v5072_v1 }
 0x159   : > { %v1012_v13 = vmul.f32 %v3650_v2, %v1011_v56  ;;  %vm1014_vm10 = vweird.f32 %v3650_v2  ;;  %v3908_v38 = vmul.f32 %v3849_v35, %v1208_v57  ;;  %v3911_v21 = vadd.f32 %v874_v43, %v3378_v39 }
 0x15a   : > { %5136 = vst [vmem:[#allocation26_spill] sm:$0xff] %v3894_v20  ;;  %1783 = vmatpush.msra.mxu0 %v3894_v20  ;;  %1979 = vmatpush.msra.mxu3 %v3894_v20  ;;  %v1522_v25 = vand.u32 2147483647, %v2661_v27  ;;  %v3916_v10 = vsub.f32 %v1747_v32, %v3894_v20  ;;  %v1330_v51 = vmul.f32 3.3333333, %v3865_v15  ;;  %v1425_v0 = vmul.f32 2.0, %v3898_v5 }
 0x15b   : > { %v1835_v9 = vand.u32 4294901760, %v1834_v8  ;;  %vm1013_vm11 = vweird.f32 %v3596_v31  ;;  %v958_v39 = vmul.f32 %v3900_v60, %v3843_v12  ;;  %v3923_v57 = vadd.f32 %v897_v54, %v865_v58  ;;  %v3933_v32 = vld [vmem:[%s3020_s9 + $0x2] ss:$0 sm:$0xff] }
 0x15c   : > { %5137 = vst [vmem:[#allocation27_spill] sm:$0xff] %v3916_v10  ;;  %v1554_v47 = vmul.f32 1.4285715, %v1522_v25  ;;  %vm1682_vm12 = vcmp.gt.f32.partialorder %v3513_v53, 0.0  ;;  %1931 = vmatpush.msra.mxu2 %v3916_v10  ;;  %vm1015_vm13 = vmor %vm1013_vm11, %vm1014_vm10  ;;  %v3930_v43 = vadd.f32 %v830_v18, %v3484_v11  ;;  %v2628_v34 = vadd.f32 -1.0, %v1425_v0 }
 0x15d   : > { %5138 = vst [vmem:[#allocation28_spill] sm:$0xff] %v3923_v57  ;;  %1836 = vmatpush.msra.mxu1 %v1835_v9  ;;  %v745_v56 = vsub.f32 %v3933_v32, %v619_v48  ;;  %v3937_v58 = vsel %vm1015_vm13, %v3650_v2, %v1012_v13  ;;  %2809 = vrsqrt.f32 %v3911_v21  ;;  %vm1394_vm14 = vcmp.lt.f32.partialorder %v3865_v15, 1.0  ;;  %v719_v13 = vpop.permute.xlu0 %718 }
 0x15e   : > { %v1586_v54 = vsub.f32 1.0, %v1554_v47  ;;  %v3943_v27 = vmul.f32 %v3937_v58, %v3596_v31  ;;  %v2597_v11 = vadd.f32 -1.0, %v1330_v51  ;;  %v2660_v18 = vadd.f32 -0.3, %v2628_v34 }
 0x15f   : > { %v5074_v8 = vand.u32 4294901760, %v3829_v36  ;;  %v1001_v25 = vsub.f32 1.5, %v3608_v33  ;;  %v3948_v48 = vmul.f32 %v3900_v60, %v958_v39  ;;  %2811 = vrsqrt.f32 %v3923_v57  ;;  %v723_v17 = vpop.permute.xlu1 %722 }
 0x160   : > { %vm1298_vm15 = vcmp.lt.f32.partialorder %v3865_v15, 0.3  ;;  %v1618_v2 = vsel %vm1394_vm14, %v1586_v54, 0.0  ;;  %v1521_v9 = vand.u32 2147483647, %v2660_v18  ;;  %v873_v47 = vmul.f32 %v745_v56, %v745_v56 }
 0x161   : > { %v1650_v0 = vsel %vm1298_vm15, %v2597_v11, %v1618_v2  ;;  %v1424_v1 = vmul.f32 2.0, %v3943_v27  ;;  %vm1297_vm0 = vcmp.lt.f32.partialorder %v3898_v5, 0.3  ;;  %v1329_v33 = vmul.f32 3.3333333, %v3898_v5  ;;  %v5139_v11 = vld [vmem:[#allocation15_spill] sm:$0xff] }
 0x162   : > { %v1714_v51 = vmul.f32 %v1650_v0, %v3857_v61  ;;  %vm1681_vm1 = vcmp.gt.f32.partialorder %v3356_v37, 0.0  ;;  %v1840_v39 = vsub.f32 %v3829_v36, %v5074_v8  ;;  %v1553_v15 = vmul.f32 1.4285715, %v1521_v9  ;;  %v5140_v0 = vld [vmem:[#allocation14_spill] sm:$0xff] }
 0x163   : > { %v2627_v34 = vadd.f32 -1.0, %v1424_v1  ;;  %v770_v54 = vsub.f32 %v3933_v32, %v719_v13  ;;  %v1002_v56 = vmul.f32 %v5139_v11, %v1001_v25  ;;  %v3962_v18 = vpop.eup %2809  ;;  %vm1003_vm2 = vweird.f32 %v5140_v0  ;;  %v5143_v8 = vld [vmem:[#allocation6_spill] sm:$0xff] }
 0x164   : > { %v1746_v61 = vsel %vm1682_vm12, %v1714_v51, 0.0  ;;  %v1841_v2 = vand.u32 4294901760, %v1840_v39  ;;  %vm1004_vm3 = vweird.f32 %v5139_v11  ;;  %vm1393_vm4 = vcmp.lt.f32.partialorder %v3898_v5, 1.0 }
 0x165   : > { %v3968_v20 = vand.u32 4294901760, %v1746_v61  ;;  %v1585_v9 = vsub.f32 1.0, %v1553_v15  ;;  %v2659_v1 = vadd.f32 -0.3, %v2627_v34  ;;  %vm1005_vm5 = vmor %vm1003_vm2, %vm1004_vm3  ;;  %v3971_v13 = vpop.eup %2811  ;;  %v2596_v25 = vadd.f32 -1.0, %v1329_v33 }
 0x166   : > { %5142 = vst [vmem:[#allocation14_spill] sm:$0xff] %v3971_v13  ;;  %v3974_v3 = vadd.f32 %v873_v47, %v5143_v8  ;;  %1842 = vmatpush.msra.mxu1 %v1841_v2  ;;  %v3977_v53 = vsel %vm1005_vm5, %v5139_v11, %v1002_v56  ;;  %v5076_v51 = vand.u32 4294901760, %v3916_v10  ;;  %v1328_v34 = vmul.f32 3.3333333, %v3943_v27  ;;  %v3995_v2 = vpop.permute.xlu2 %710 }
 0x167   : > { %5141 = vst [vmem:[#allocation15_spill] sm:$0xff] %v3968_v20  ;;  %1785 = vmatpush.msra.mxu0 %v3968_v20  ;;  %1981 = vmatpush.msra.mxu3 %v3968_v20  ;;  %v1617_v39 = vsel %vm1393_vm4, %v1585_v9, 0.0  ;;  %v3983_v15 = vsub.f32 %v1746_v61, %v3968_v20  ;;  %v1520_v33 = vand.u32 2147483647, %v2659_v1  ;;  %v898_v47 = vmul.f32 %v770_v54, %v770_v54 }
 0x168   : > { %v1649_v8 = vsel %vm1297_vm0, %v2596_v25, %v1617_v39  ;;  %v3990_v11 = vmul.f32 %v3977_v53, %v5140_v0  ;;  %v1846_v56 = vsub.f32 %v3916_v10, %v5076_v51  ;;  %v948_v61 = vmul.f32 %v3962_v18, %v3911_v21 }
 0x169   : > { %v1713_v9 = vmul.f32 %v1649_v8, %v3891_v26  ;;  %1934 = vmatpush.msra.mxu2 %v3983_v15  ;;  %v1552_v5 = vmul.f32 1.4285715, %v1520_v33  ;;  %v5085_v54 = vand.u32 4294901760, %v3983_v15  ;;  %v1178_v1 = vmul.f32 %v3971_v13, %v3923_v57 }
 0x16a   : > { %2813 = vrsqrt.f32 %v3974_v3  ;;  %vm1392_vm6 = vcmp.lt.f32.partialorder %v3943_v27, 1.0  ;;  %v1423_v25 = vmul.f32 2.0, %v3990_v11  ;;  %v1847_v20 = vand.u32 4294901760, %v1846_v56 }
 0x16b   : > { %v1745_v39 = vsel %vm1681_vm1, %v1713_v9, 0.0  ;;  %v1584_v51 = vsub.f32 1.0, %v1552_v5  ;;  %v1852_v26 = vsub.f32 %v3983_v15, %v5085_v54  ;;  %v2595_v8 = vadd.f32 -1.0, %v1328_v34 }
 0x16c   : > { %v4012_v33 = vand.u32 4294901760, %v1745_v39  ;;  %v4015_v57 = vadd.f32 %v898_v47, %v3868_v50  ;;  %v2626_v10 = vadd.f32 -1.0, %v1423_v25  ;;  %vm1296_vm7 = vcmp.lt.f32.partialorder %v3943_v27, 0.3  ;;  %1848 = vmatpush.msra.mxu1 %v1847_v20 }
 0x16d   : > { %v1616_v36 = vsel %vm1392_vm6, %v1584_v51, 0.0  ;;  %v1853_v37 = vand.u32 4294901760, %v1852_v26  ;;  %v991_v9 = vsub.f32 1.5, %v3785_v7  ;;  %vm1680_vm8 = vcmp.gt.f32.partialorder %v3596_v31, 0.0 }
 0x16e   : > { %5144 = vst [vmem:[#allocation6_spill] sm:$0xff] %v4012_v33  ;;  %1787 = vmatpush.msra.mxu0 %v4012_v33  ;;  %1983 = vmatpush.msra.mxu3 %v4012_v33  ;;  %v1648_v56 = vsel %vm1296_vm7, %v2595_v8, %v1616_v36  ;;  %v4023_v34 = vsub.f32 %v1745_v39, %v4012_v33  ;;  %v2658_v50 = vadd.f32 -0.3, %v2626_v10  ;;  %vm993_vm9 = vweird.f32 %v3659_v59 }
 0x16f   : > { %5145 = vst [vmem:[#allocation29_spill] sm:$0xff] %v4015_v57  ;;  %v1712_v47 = vmul.f32 %v1648_v56, %v3937_v58  ;;  %1854 = vmatpush.msra.mxu1 %v1853_v37  ;;  %v992_v27 = vmul.f32 %v3702_v6, %v991_v9  ;;  %vm994_vm10 = vweird.f32 %v3702_v6  ;;  %2815 = vrsqrt.f32 %v4015_v57 }
 0x170   : > { %5146 = vst [vmem:[#allocation30_spill] sm:$0xff] %v4023_v34  ;;  %v4029_v7 = vpop.eup %2813  ;;  %1937 = vmatpush.msra.mxu2 %v4023_v34  ;;  %v1519_v36 = vand.u32 2147483647, %v2658_v50  ;;  %vm995_vm11 = vmor %vm993_vm9, %vm994_vm10  ;;  %v5084_v20 = vand.u32 4294901760, %v4023_v34  ;;  %v771_v10 = vsub.f32 %v3933_v32, %v723_v17  ;;  %v4036_v58 = vmul.f32 0.5, %v3948_v48  ;;  %v538_v48 = vpop.permute.xlu2 %537 }
 0x171   : > { %v1744_v51 = vsel %vm1680_vm8, %v1712_v47, 0.0  ;;  %v1327_v5 = vmul.f32 3.3333333, %v3990_v11  ;;  %v4042_v25 = vsel %vm995_vm11, %v3702_v6, %v992_v27  ;;  %v949_v31 = vmul.f32 %v3962_v18, %v948_v61 }
 0x172   : > { %v4044_v39 = vand.u32 4294901760, %v1744_v51  ;;  %v1551_v26 = vmul.f32 1.4285715, %v1519_v36  ;;  %v4048_v8 = vmul.f32 %v4042_v25, %v3659_v59  ;;  %v1858_v17 = vsub.f32 %v4023_v34, %v5084_v20 }
 0x173   : > { %v1179_v37 = vmul.f32 %v3971_v13, %v1178_v1  ;;  %v899_v9 = vmul.f32 %v771_v10, %v771_v10  ;;  %v981_v6 = vsub.f32 1.5, %v3851_v22  ;;  %v938_v56 = vmul.f32 %v4029_v7, %v3974_v3 }
 0x174   : > { %5147 = vst [vmem:[#allocation31_spill] sm:$0xff] %v4044_v39  ;;  %1789 = vmatpush.msra.mxu0 %v4044_v39  ;;  %1985 = vmatpush.msra.mxu3 %v4044_v39  ;;  %v1583_v50 = vsub.f32 1.0, %v1551_v26  ;;  %vm1679_vm12 = vcmp.gt.f32.partialorder %v5140_v0, 0.0  ;;  %v4062_v47 = vsub.f32 %v1744_v51, %v4044_v39  ;;  %v2594_v27 = vadd.f32 -1.0, %v1327_v5  ;;  %v699_v26 = vpop.permute.xlu0 %698  ;;  %v550_v51 = vpop.permute.xlu1 %549 }
 0x175   : > { %vm1391_vm13 = vcmp.lt.f32.partialorder %v3990_v11, 1.0  ;;  %v1422_v61 = vmul.f32 2.0, %v4048_v8  ;;  %v1859_v1 = vand.u32 4294901760, %v1858_v17  ;;  %v4066_v22 = vpop.eup %2815  ;;  %vm1295_vm14 = vcmp.lt.f32.partialorder %v3990_v11, 0.3 }
 0x176   : > { %5148 = vst [vmem:[#allocation32_spill] sm:$0xff] %v4062_v47  ;;  %v1615_v36 = vsel %vm1391_vm13, %v1583_v50, 0.0  ;;  %1940 = vmatpush.msra.mxu2 %v4062_v47  ;;  %v5088_v10 = vand.u32 4294901760, %v4062_v47  ;;  %v604_v20 = vsub.f32 %v3833_v55, %v538_v48  ;;  %v4073_v39 = vadd.f32 %v899_v9, %v3808_v45 }
 0x177   : > { %5149 = vst [vmem:[#allocation33_spill] sm:$0xff] %v4066_v22  ;;  %v1647_v54 = vsel %vm1295_vm14, %v2594_v27, %v1615_v36  ;;  %v2625_v5 = vadd.f32 -1.0, %v1422_v61  ;;  %1860 = vmatpush.msra.mxu1 %v1859_v1  ;;  %v982_v17 = vmul.f32 %v3761_v19, %v981_v6  ;;  %v939_v33 = vmul.f32 %v4029_v7, %v938_v56 }
 0x178   : > { %v1711_v11 = vmul.f32 %v1647_v54, %v3977_v53  ;;  %v768_v50 = vsub.f32 %v3933_v32, %v3995_v2  ;;  %v1864_v48 = vsub.f32 %v4062_v47, %v5088_v10  ;;  %v1188_v27 = vmul.f32 %v4066_v22, %v4015_v57 }
 0x179   : > { %v2657_v61 = vadd.f32 -0.3, %v2625_v5  ;;  %vm983_vm15 = vweird.f32 %v3696_v4  ;;  %vm984_vm0 = vweird.f32 %v3761_v19  ;;  %v765_v53 = vsub.f32 %v3933_v32, %v699_v26  ;;  %v534_v26 = vpop.permute.xlu2 %533 }
 0x17a   : > { %v1743_v45 = vsel %vm1679_vm12, %v1711_v11, 0.0  ;;  %v1865_v9 = vand.u32 4294901760, %v1864_v48  ;;  %v829_v54 = vmul.f32 %v604_v20, %v604_v20  ;;  %vm985_vm1 = vmor %vm983_vm15, %vm984_vm0  ;;  %2817 = vrsqrt.f32 %v4073_v39 }
 0x17b   : > { %v4090_v2 = vand.u32 4294901760, %v1743_v45  ;;  %v1518_v6 = vand.u32 2147483647, %v2657_v61  ;;  %v4094_v56 = vsel %vm985_vm1, %v3761_v19, %v982_v17  ;;  %v4096_v1 = vmul.f32 0.5, %v949_v31  ;;  %v5152_v61 = vld [vmem:[#allocation8_spill] sm:$0xff] }
 0x17c   : > { %v1326_v36 = vmul.f32 3.3333333, %v4048_v8  ;;  %1866 = vmatpush.msra.mxu1 %v1865_v9  ;;  %v4101_v0 = vmul.f32 %v4094_v56, %v3696_v4  ;;  %v607_v20 = vsub.f32 %v3833_v55, %v550_v51  ;;  %v4104_v5 = vmul.f32 0.5, %v1179_v37 }
 0x17d   : > { %5150 = vst [vmem:[#allocation34_spill] sm:$0xff] %v4090_v2  ;;  %v4106_v11 = vmul.f32 0.5, %v939_v33  ;;  %1791 = vmatpush.msra.mxu0 %v4090_v2  ;;  %1987 = vmatpush.msra.mxu3 %v4090_v2  ;;  %v4111_v19 = vsub.f32 %v1743_v45, %v4090_v2  ;;  %v1550_v31 = vmul.f32 1.4285715, %v1518_v6  ;;  %v1189_v17 = vmul.f32 %v4066_v22, %v1188_v27  ;;  %v522_v27 = vpop.permute.xlu0 %521 }
 0x17e   : > { %5151 = vst [vmem:[#allocation35_spill] sm:$0xff] %v4104_v5  ;;  %v893_v48 = vmul.f32 %v765_v53, %v765_v53  ;;  %v861_v9 = vadd.f32 %v829_v54, %v5152_v61  ;;  %v971_v51 = vsub.f32 1.5, %v3886_v52  ;;  %v896_v37 = vmul.f32 %v768_v50, %v768_v50  ;;  %v546_v53 = vpop.permute.xlu1 %545 }
 0x17f   : > { %1943 = vmatpush.msra.mxu2 %v4111_v19  ;;  %v1582_v33 = vsub.f32 1.0, %v1550_v31  ;;  %v5099_v10 = vand.u32 4294901760, %v4111_v19  ;;  %v1421_v13 = vmul.f32 2.0, %v4101_v0  ;;  %v2593_v5 = vadd.f32 -1.0, %v1326_v36 }
 0x180   : > { %vm1390_vm2 = vcmp.lt.f32.partialorder %v4048_v8, 1.0  ;;  %vm1678_vm3 = vcmp.gt.f32.partialorder %v3659_v59, 0.0  ;;  %v832_v45 = vmul.f32 %v607_v20, %v607_v20  ;;  %v4121_v6 = vpop.eup %2817  ;;  %vm1294_vm4 = vcmp.lt.f32.partialorder %v4048_v8, 0.3 }
 0x181   : > { %v1614_v52 = vsel %vm1390_vm2, %v1582_v33, 0.0  ;;  %v1870_v50 = vsub.f32 %v4111_v19, %v5099_v10  ;;  %v2624_v54 = vadd.f32 -1.0, %v1421_v13  ;;  %v4127_v31 = vmul.f32 0.5, %v1189_v17  ;;  %v5154_v33 = vld [vmem:[#allocation9_spill] sm:$0xff] }
 0x182   : > { %v1646_v36 = vsel %vm1294_vm4, %v2593_v5, %v1614_v52  ;;  %v4129_v61 = vadd.f32 %v893_v48, %v861_v9  ;;  %v972_v2 = vmul.f32 %v3819_v28, %v971_v51  ;;  %v600_v57 = vsub.f32 %v3833_v55, %v522_v27 }
 0x183   : > { %v1710_v20 = vmul.f32 %v1646_v36, %v4042_v25  ;;  %v1871_v22 = vand.u32 4294901760, %v1870_v50  ;;  %v2656_v47 = vadd.f32 -0.3, %v2624_v54  ;;  %v1198_v8 = vmul.f32 %v4121_v6, %v4073_v39 }
 0x184   : > { %5153 = vst [vmem:[#allocation8_spill] sm:$0xff] %v4129_v61  ;;  %v864_v34 = vadd.f32 %v832_v45, %v5154_v33  ;;  %vm973_vm5 = vweird.f32 %v3733_v63  ;;  %vm974_vm6 = vweird.f32 %v3819_v28  ;;  %v1325_v5 = vmul.f32 3.3333333, %v4101_v0  ;;  %v695_v45 = vpop.permute.xlu2 %694 }
 0x185   : > { %v1742_v13 = vsel %vm1678_vm3, %v1710_v20, 0.0  ;;  %1872 = vmatpush.msra.mxu1 %v1871_v22  ;;  %v1517_v25 = vand.u32 2147483647, %v2656_v47  ;;  %vm975_vm7 = vmor %vm973_vm5, %vm974_vm6  ;;  %v961_v17 = vsub.f32 1.5, %v4036_v58  ;;  %2819 = vrsqrt.f32 %v4129_v61 }
 0x186   : > { %v4143_v48 = vand.u32 4294901760, %v1742_v13  ;;  %v603_v9 = vsub.f32 %v3833_v55, %v534_v26  ;;  %v4148_v51 = vsel %vm975_vm7, %v3819_v28, %v972_v2  ;;  %v825_v59 = vmul.f32 %v600_v57, %v600_v57  ;;  %v707_v20 = vpop.permute.xlu1 %706 }
 0x187   : > { %v1549_v27 = vmul.f32 1.4285715, %v1517_v25  ;;  %v4152_v22 = vmul.f32 %v4148_v51, %v3733_v63  ;;  %v962_v47 = vmul.f32 %v3900_v60, %v961_v17  ;;  %vm1389_vm8 = vcmp.lt.f32.partialorder %v4101_v0, 1.0 }
 0x188   : > { %1793 = vmatpush.msra.mxu0 %v4143_v48  ;;  %1989 = vmatpush.msra.mxu3 %v4143_v48  ;;  %v4158_v58 = vsub.f32 %v1742_v13, %v4143_v48  ;;  %vm963_vm9 = vweird.f32 %v3843_v12  ;;  %vm964_vm10 = vweird.f32 %v3900_v60  ;;  %v1199_v28 = vmul.f32 %v4121_v6, %v1198_v8 }
 0x189   : > { %v2592_v57 = vadd.f32 -1.0, %v1325_v5  ;;  %v1581_v2 = vsub.f32 1.0, %v1549_v27  ;;  %v4164_v26 = vadd.f32 %v896_v37, %v864_v34  ;;  %vm965_vm11 = vmor %vm963_vm9, %vm964_vm10  ;;  %v828_v50 = vmul.f32 %v603_v9, %v603_v9  ;;  %v5157_v27 = vld [vmem:[#allocation11_spill] sm:$0xff] }
 0x18a   : > { %1946 = vmatpush.msra.mxu2 %v4158_v58  ;;  %v5098_v52 = vand.u32 4294901760, %v4158_v58  ;;  %v1420_v54 = vmul.f32 2.0, %v4152_v22  ;;  %v4170_v36 = vsel %vm965_vm11, %v3900_v60, %v962_v47  ;;  %vm1293_vm12 = vcmp.lt.f32.partialorder %v4101_v0, 0.3 }
 0x18b   : > { %v1613_v33 = vsel %vm1389_vm8, %v1581_v2, 0.0  ;;  %v606_v8 = vsub.f32 %v3833_v55, %v546_v53  ;;  %v4176_v34 = vmul.f32 %v4170_v36, %v3843_v12  ;;  %v4178_v37 = vpop.eup %2819  ;;  %vm1677_vm13 = vcmp.gt.f32.partialorder %v3696_v4, 0.0  ;;  %v5156_v53 = vld [vmem:[#allocation10_spill] sm:$0xff] }
 0x18c   : > { %5155 = vst [vmem:[#allocation9_spill] sm:$0xff] %v4178_v37  ;;  %v1645_v13 = vsel %vm1293_vm12, %v2592_v57, %v1613_v33  ;;  %v1876_v60 = vsub.f32 %v4158_v58, %v5098_v52  ;;  %v2623_v5 = vadd.f32 -1.0, %v1420_v54  ;;  %v4184_v25 = vmul.f32 0.5, %v1199_v28 }
 0x18d   : > { %v1709_v0 = vmul.f32 %v1645_v13, %v4094_v56  ;;  %2821 = vrsqrt.f32 %v4164_v26  ;;  %v4189_v17 = vadd.f32 %v825_v59, %v5156_v53  ;;  %v860_v47 = vadd.f32 %v828_v50, %v5157_v27  ;;  %v4198_v53 = vpop.permute.xlu2 %690 }
 0x18e   : > { %v1877_v9 = vand.u32 4294901760, %v1876_v60  ;;  %v2655_v57 = vadd.f32 -0.3, %v2623_v5  ;;  %v1419_v4 = vmul.f32 2.0, %v4176_v34  ;;  %v831_v33 = vmul.f32 %v606_v8, %v606_v8 }
 0x18f   : > { %v1741_v2 = vsel %vm1677_vm13, %v1709_v0, 0.0  ;;  %v764_v52 = vsub.f32 %v3933_v32, %v695_v45  ;;  %v951_v28 = vsub.f32 1.5, %v4096_v1  ;;  %v767_v59 = vsub.f32 %v3933_v32, %v707_v20  ;;  %v5160_v0 = vld [vmem:[#allocation13_spill] sm:$0xff] }
 0x190   : > { %v4195_v54 = vand.u32 4294901760, %v1741_v2  ;;  %1878 = vmatpush.msra.mxu1 %v1877_v9  ;;  %v1516_v56 = vand.u32 2147483647, %v2655_v57  ;;  %v2622_v13 = vadd.f32 -1.0, %v1419_v4  ;;  %v1324_v50 = vmul.f32 3.3333333, %v4152_v22 }
 0x191   : > { %v952_v60 = vmul.f32 %v3962_v18, %v951_v28  ;;  %vm953_vm14 = vweird.f32 %v3911_v21  ;;  %vm954_vm15 = vweird.f32 %v3962_v18  ;;  %v4206_v1 = vmul.f32 %v4178_v37, %v4129_v61 }
 0x192   : > { %5158 = vst [vmem:[#allocation10_spill] sm:$0xff] %v4195_v54  ;;  %1795 = vmatpush.msra.mxu0 %v4195_v54  ;;  %1991 = vmatpush.msra.mxu3 %v4195_v54  ;;  %v4211_v45 = vsub.f32 %v1741_v2, %v4195_v54  ;;  %v1548_v20 = vmul.f32 1.4285715, %v1516_v56  ;;  %v2654_v8 = vadd.f32 -0.3, %v2622_v13  ;;  %vm955_vm0 = vmor %vm953_vm14, %vm954_vm15  ;;  %v863_v9 = vadd.f32 %v831_v33, %v5160_v0  ;;  %v703_v56 = vpop.permute.xlu1 %702 }
 0x193   : > { %5159 = vst [vmem:[#allocation11_spill] sm:$0xff] %v4206_v1  ;;  %v4213_v5 = vpop.eup %2821  ;;  %vm1292_vm1 = vcmp.lt.f32.partialorder %v4152_v22, 0.3  ;;  %v892_v27 = vmul.f32 %v764_v52, %v764_v52  ;;  %v4218_v57 = vsel %vm955_vm0, %v3962_v18, %v952_v60  ;;  %v895_v10 = vmul.f32 %v767_v59, %v767_v59 }
 0x194   : > { %1949 = vmatpush.msra.mxu2 %v4211_v45  ;;  %v1580_v4 = vsub.f32 1.0, %v1548_v20  ;;  %v5104_v28 = vand.u32 4294901760, %v4211_v45  ;;  %v1515_v2 = vand.u32 2147483647, %v2654_v8  ;;  %v2591_v13 = vadd.f32 -1.0, %v1324_v50 }
 0x195   : > { %vm1388_vm2 = vcmp.lt.f32.partialorder %v4152_v22, 1.0  ;;  %v1323_v61 = vmul.f32 3.3333333, %v4176_v34  ;;  %v4226_v33 = vmul.f32 %v4218_v57, %v3911_v21  ;;  %v941_v20 = vsub.f32 1.5, %v4106_v11  ;;  %v683_v22 = vpop.permute.xlu2 %682 }
 0x196   : > { %v1612_v52 = vsel %vm1388_vm2, %v1580_v4, 0.0  ;;  %v1882_v18 = vsub.f32 %v4211_v45, %v5104_v28  ;;  %v1547_v60 = vmul.f32 1.4285715, %v1515_v2  ;;  %v4234_v59 = vmul.f32 %v4213_v5, %v4164_v26 }
 0x197   : > { %v1644_v50 = vsel %vm1292_vm1, %v2591_v13, %v1612_v52  ;;  %vm1676_vm3 = vcmp.gt.f32.partialorder %v3733_v63, 0.0  ;;  %v766_v8 = vsub.f32 %v3933_v32, %v703_v56  ;;  %v4241_v1 = vadd.f32 %v895_v10, %v863_v9  ;;  %v5162_v52 = vld [vmem:[#allocation19_spill] sm:$0xff] }
 0x198   : > { %v1708_v0 = vmul.f32 %v1644_v50, %v4148_v51  ;;  %v1883_v4 = vand.u32 4294901760, %v1882_v18  ;;  %v1579_v37 = vsub.f32 1.0, %v1547_v60  ;;  %v4243_v2 = vadd.f32 %v892_v27, %v860_v47 }
 0x199   : > { %v2590_v11 = vadd.f32 -1.0, %v1323_v61  ;;  %vm1387_vm4 = vcmp.lt.f32.partialorder %v4176_v34, 1.0  ;;  %v1418_v28 = vmul.f32 2.0, %v4226_v33  ;;  %vm1291_vm5 = vcmp.lt.f32.partialorder %v4176_v34, 0.3 }
 0x19a   : > { %5161 = vst [vmem:[#allocation13_spill] sm:$0xff] %v4243_v2  ;;  %v1740_v54 = vsel %vm1676_vm3, %v1708_v0, 0.0  ;;  %1884 = vmatpush.msra.mxu1 %v1883_v4  ;;  %v1611_v63 = vsel %vm1387_vm4, %v1579_v37, 0.0  ;;  %v942_v56 = vmul.f32 %v4029_v7, %v941_v20  ;;  %v894_v9 = vmul.f32 %v766_v8, %v766_v8 }
 0x19b   : > { %v4249_v51 = vand.u32 4294901760, %v1740_v54  ;;  %v1643_v13 = vsel %vm1291_vm5, %v2590_v11, %v1611_v63  ;;  %v2621_v10 = vadd.f32 -1.0, %v1418_v28  ;;  %2823 = vrsqrt.f32 %v4241_v1 }
 0x19c   : > { %v1707_v47 = vmul.f32 %v1643_v13, %v4170_v36  ;;  %vm943_vm6 = vweird.f32 %v3974_v3  ;;  %vm944_vm7 = vweird.f32 %v4029_v7  ;;  %vm1675_vm8 = vcmp.gt.f32.partialorder %v3843_v12, 0.0 }
 0x19d   : > { %1797 = vmatpush.msra.mxu0 %v4249_v51  ;;  %1993 = vmatpush.msra.mxu3 %v4249_v51  ;;  %v4258_v61 = vsub.f32 %v1740_v54, %v4249_v51  ;;  %v2653_v34 = vadd.f32 -0.3, %v2621_v10  ;;  %v761_v37 = vsub.f32 %v3933_v32, %v683_v22  ;;  %vm945_vm9 = vmor %vm943_vm6, %vm944_vm7  ;;  %v1322_v27 = vmul.f32 3.3333333, %v4226_v33  ;;  %v5163_v22 = vld [vmem:[#allocation18_spill] sm:$0xff] }
 0x19e   : > { %v1739_v36 = vsel %vm1675_vm8, %v1707_v47, 0.0  ;;  %v4264_v28 = vsel %vm945_vm9, %v4029_v7, %v942_v56  ;;  %v1250_v18 = vmul.f32 0.5, %v5162_v52  ;;  %v4272_v12 = vadd.f32 %v894_v9, %v3930_v43 }
 0x19f   : > { %1952 = vmatpush.msra.mxu2 %v4258_v61  ;;  %v4268_v60 = vand.u32 4294901760, %v1739_v36  ;;  %v5107_v54 = vand.u32 4294901760, %v4258_v61  ;;  %v1514_v20 = vand.u32 2147483647, %v2653_v34  ;;  %2825 = vrsqrt.f32 %v4243_v2  ;;  %v5164_v34 = vld [vmem:[#allocation16_spill] sm:$0xff] }
 0x1a0   : > { %v763_v50 = vsub.f32 %v3933_v32, %v4198_v53  ;;  %v4279_v7 = vmul.f32 %v4264_v28, %v3974_v3  ;;  %v1251_v8 = vsub.f32 1.5, %v1250_v18  ;;  %vm1386_vm10 = vcmp.lt.f32.partialorder %v4226_v33, 1.0 }
 0x1a1   : > { %1799 = vmatpush.msra.mxu0 %v4268_v60  ;;  %v1888_v0 = vsub.f32 %v4258_v61, %v5107_v54  ;;  %1995 = vmatpush.msra.mxu3 %v4268_v60  ;;  %v4287_v43 = vsub.f32 %v1739_v36, %v4268_v60  ;;  %v1546_v4 = vmul.f32 1.4285715, %v1514_v20  ;;  %v4290_v32 = vpop.eup %2823  ;;  %v2589_v53 = vadd.f32 -1.0, %v1322_v27 }
 0x1a2   : > { %v889_v11 = vmul.f32 %v761_v37, %v761_v37  ;;  %v1417_v63 = vmul.f32 2.0, %v4279_v7  ;;  %vm1254_vm11 = vweird.f32 %v5163_v22  ;;  %2827 = vrsqrt.f32 %v4272_v12 }
 0x1a3   : > { %v1889_v56 = vand.u32 4294901760, %v1888_v0  ;;  %1955 = vmatpush.msra.mxu2 %v4287_v43  ;;  %v1578_v13 = vsub.f32 1.0, %v1546_v4  ;;  %v5106_v10 = vand.u32 4294901760, %v4287_v43  ;;  %v1252_v47 = vmul.f32 %v5163_v22, %v1251_v8 }
 0x1a4   : > { %v2620_v9 = vadd.f32 -1.0, %v1417_v63  ;;  %vm1253_vm12 = vweird.f32 %v5164_v34  ;;  %v1240_v36 = vmul.f32 0.5, %v3764_v44  ;;  %v1158_v37 = vmul.f32 %v4290_v32, %v4241_v1 }
 0x1a5   : > { %1890 = vmatpush.msra.mxu1 %v1889_v56  ;;  %vm1290_vm13 = vcmp.lt.f32.partialorder %v4226_v33, 0.3  ;;  %v1610_v27 = vsel %vm1386_vm10, %v1578_v13, 0.0  ;;  %v1894_v52 = vsub.f32 %v4287_v43, %v5106_v10  ;;  %vm1255_vm14 = vmor %vm1253_vm12, %vm1254_vm11  ;;  %v4310_v18 = vpop.eup %2825  ;;  %v4315_v4 = vmul.f32 %v763_v50, %v763_v50 }
 0x1a6   : > { %v1642_v20 = vsel %vm1290_vm13, %v2589_v53, %v1610_v27  ;;  %v2652_v44 = vadd.f32 -0.3, %v2620_v9  ;;  %v4313_v8 = vsel %vm1255_vm14, %v5163_v22, %v1252_v47  ;;  %v1241_v0 = vsub.f32 1.5, %v1240_v36  ;;  %v530_v27 = vpop.permute.xlu1 %529 }
 0x1a7   : > { %v1706_v33 = vmul.f32 %v1642_v20, %v4218_v57  ;;  %v1895_v63 = vand.u32 4294901760, %v1894_v52  ;;  %v4319_v56 = vadd.f32 %v889_v11, %v4189_v17  ;;  %vm1674_vm15 = vcmp.gt.f32.partialorder %v3911_v21, 0.0 }
 0x1a8   : > { %v1513_v13 = vand.u32 2147483647, %v2652_v44  ;;  %v4324_v10 = vmul.f32 %v4313_v8, %v5164_v34  ;;  %v1242_v53 = vmul.f32 %v3682_v30, %v1241_v0  ;;  %v4327_v22 = vpop.eup %2827  ;;  %v1321_v50 = vmul.f32 3.3333333, %v4279_v7 }
 0x1a9   : > { %v1738_v9 = vsel %vm1674_vm15, %v1706_v33, 0.0  ;;  %1896 = vmatpush.msra.mxu1 %v1895_v63  ;;  %vm1243_vm0 = vweird.f32 %v3625_v40  ;;  %vm1244_vm1 = vweird.f32 %v3682_v30  ;;  %v4334_v21 = vmul.f32 %v4310_v18, %v4243_v2 }
 0x1aa   : > { %v1159_v17 = vmul.f32 %v4290_v32, %v1158_v37  ;;  %v4337_v57 = vand.u32 4294901760, %v1738_v9  ;;  %v1545_v11 = vmul.f32 1.4285715, %v1513_v13  ;;  %vm1245_vm2 = vmor %vm1243_vm0, %vm1244_vm1  ;;  %2829 = vrsqrt.f32 %v4319_v56 }
 0x1ab   : > { %vm1673_vm3 = vcmp.gt.f32.partialorder %v3974_v3, 0.0  ;;  %v1448_v47 = vmul.f32 2.0, %v4324_v10  ;;  %v4343_v36 = vsel %vm1245_vm2, %v3682_v30, %v1242_v53  ;;  %v1148_v52 = vmul.f32 %v4327_v22, %v4272_v12 }
 0x1ac   : > { %1801 = vmatpush.msra.mxu0 %v4337_v57  ;;  %1997 = vmatpush.msra.mxu3 %v4337_v57  ;;  %v4348_v37 = vsub.f32 %v1738_v9, %v4337_v57  ;;  %v1577_v20 = vsub.f32 1.0, %v1545_v11  ;;  %v4354_v44 = vmul.f32 %v4343_v36, %v3625_v40  ;;  %v2588_v0 = vadd.f32 -1.0, %v1321_v50 }
 0x1ad   : > { %vm1385_vm4 = vcmp.lt.f32.partialorder %v4279_v7, 1.0  ;;  %v2651_v30 = vadd.f32 -1.0, %v1448_v47  ;;  %v1230_v33 = vmul.f32 0.5, %v3788_v23  ;;  %vm1289_vm5 = vcmp.lt.f32.partialorder %v4279_v7, 0.3 }
 0x1ae   : > { %1958 = vmatpush.msra.mxu2 %v4348_v37  ;;  %v1609_v63 = vsel %vm1385_vm4, %v1577_v20, 0.0  ;;  %v5110_v13 = vand.u32 4294901760, %v4348_v37  ;;  %v602_v53 = vsub.f32 %v3833_v55, %v530_v27  ;;  %v4362_v9 = vmul.f32 0.5, %v1159_v17 }
 0x1af   : > { %v1641_v11 = vsel %vm1289_vm5, %v2588_v0, %v1609_v63  ;;  %v2683_v54 = vadd.f32 -0.3, %v2651_v30  ;;  %v1447_v50 = vmul.f32 2.0, %v4354_v44  ;;  %v4366_v2 = vmul.f32 %v4327_v22, %v1148_v52 }
 0x1b0   : > { %v1705_v23 = vmul.f32 %v1641_v11, %v4264_v28  ;;  %v1900_v7 = vsub.f32 %v4348_v37, %v5110_v13  ;;  %v1352_v47 = vmul.f32 3.3333333, %v4324_v10  ;;  %v4373_v20 = vpop.eup %2829  ;;  %v1231_v27 = vsub.f32 1.5, %v1230_v33 }
 0x1b1   : > { %v1544_v55 = vand.u32 2147483647, %v2683_v54  ;;  %v2650_v17 = vadd.f32 -1.0, %v1447_v50  ;;  %vm1234_vm6 = vweird.f32 %v3716_v49  ;;  %vm1704_vm7 = vcmp.gt.f32.partialorder %v5164_v34, 0.0 }
 0x1b2   : > { %v1737_v0 = vsel %vm1673_vm3, %v1705_v23, 0.0  ;;  %v1901_v52 = vand.u32 4294901760, %v1900_v7  ;;  %v827_v28 = vmul.f32 %v602_v53, %v602_v53  ;;  %vm1233_vm8 = vweird.f32 %v3672_v14 }
 0x1b3   : > { %v4380_v30 = vand.u32 4294901760, %v1737_v0  ;;  %v1576_v63 = vmul.f32 1.4285715, %v1544_v55  ;;  %v2682_v11 = vadd.f32 -0.3, %v2650_v17  ;;  %v1232_v13 = vmul.f32 %v3716_v49, %v1231_v27  ;;  %vm1235_vm10 = vmor %vm1233_vm8, %vm1234_vm6  ;;  %v5166_v55 = vld [vmem:[#allocation12_spill] sm:$0xff] }
 0x1b4   : > { %1902 = vmatpush.msra.mxu1 %v1901_v52  ;;  %v2619_v54 = vadd.f32 -1.0, %v1352_v47  ;;  %vm1416_vm9 = vcmp.lt.f32.partialorder %v4324_v10, 1.0  ;;  %v1351_v33 = vmul.f32 3.3333333, %v4354_v44  ;;  %v1220_v3 = vmul.f32 0.5, %v3854_v42 }
 0x1b5   : > { %1803 = vmatpush.msra.mxu0 %v4380_v30  ;;  %1999 = vmatpush.msra.mxu3 %v4380_v30  ;;  %v1608_v53 = vsub.f32 1.0, %v1576_v63  ;;  %v4389_v50 = vsub.f32 %v1737_v0, %v4380_v30  ;;  %v1543_v23 = vand.u32 2147483647, %v2682_v11  ;;  %v4392_v7 = vsel %vm1235_vm10, %v3716_v49, %v1232_v13 }
 0x1b6   : > { %v5165_v47 = vand.u32 4294901760, %v3759_v24  ;;  %v859_v17 = vadd.f32 %v827_v28, %v5166_v55  ;;  %v4399_v42 = vmul.f32 %v4392_v7, %v3672_v14  ;;  %v1221_v27 = vsub.f32 1.5, %v1220_v3 }
 0x1b7   : > { %v1210_v52 = vmul.f32 0.5, %v3908_v38  ;;  %v4404_v0 = vmul.f32 %v4373_v20, %v4319_v56  ;;  %vm1320_vm11 = vcmp.lt.f32.partialorder %v4324_v10, 0.3  ;;  %v1640_v49 = vsel %vm1416_vm9, %v1608_v53, 0.0  ;;  %1961 = vmatpush.msra.mxu2 %v4389_v50 }
 0x1b8   : > { %2010 = vmatpush.msrb.mxu0 %v5165_v47  ;;  %v1575_v24 = vmul.f32 1.4285715, %v1543_v23  ;;  %v1672_v13 = vsel %vm1320_vm11, %v2619_v54, %v1640_v49  ;;  %v5167_v28 = vand.u32 4294901760, %v3647_v46  ;;  %vm1319_vm12 = vcmp.lt.f32.partialorder %v4354_v44, 0.3 }
 0x1b9   : > { %vm1415_vm13 = vcmp.lt.f32.partialorder %v4354_v44, 1.0  ;;  %vm1224_vm14 = vweird.f32 %v3796_v41  ;;  %v1736_v38 = vmul.f32 %v1672_v13, %v4313_v8  ;;  %v1446_v11 = vmul.f32 2.0, %v4399_v42 }
 0x1ba   : > { %2014 = vmatpush.msrb.mxu0 %v5167_v28  ;;  %v1607_v63 = vsub.f32 1.0, %v1575_v24  ;;  %v1222_v10 = vmul.f32 %v3796_v41, %v1221_v27  ;;  %v2618_v3 = vadd.f32 -1.0, %v1351_v33  ;;  %v4419_v53 = vadd.f32 %v4315_v4, %v859_v17 }
 0x1bb   : > { %v5168_v46 = vand.u32 4294901760, %v3782_v29  ;;  %vm1223_vm15 = vweird.f32 %v3719_v62  ;;  %v1211_v54 = vsub.f32 1.5, %v1210_v52  ;;  %v1768_v23 = vsel %vm1704_vm7, %v1736_v38, 0.0 }
 0x1bc   : > { %v1639_v47 = vsel %vm1415_vm13, %v1607_v63, 0.0  ;;  %v2649_v8 = vadd.f32 -1.0, %v1446_v11  ;;  %vm1225_vm0 = vmor %vm1223_vm15, %vm1224_vm14  ;;  %vm1214_vm1 = vweird.f32 %v3849_v35  ;;  %v4427_v55 = vand.u32 4294901760, %v1768_v23 }
 0x1bd   : > { %2018 = vmatpush.msrb.mxu0 %v5168_v46  ;;  %v1671_v4 = vsel %vm1319_vm12, %v2618_v3, %v1639_v47  ;;  %v5169_v33 = vand.u32 4294901760, %v3817_v16  ;;  %v4434_v29 = vsel %vm1225_vm0, %v3796_v41, %v1222_v10  ;;  %v1905_v17 = vand.u32 4294901760, %v4389_v50  ;;  %v5173_v10 = vld [vmem:[#allocation27_spill] sm:$0xff] }
 0x1be   : > { %v1735_v34 = vmul.f32 %v1671_v4, %v4343_v36  ;;  %v2681_v27 = vadd.f32 -0.3, %v2649_v8  ;;  %v4440_v52 = vmul.f32 %v4434_v29, %v3719_v62  ;;  %v1212_v49 = vmul.f32 %v3849_v35, %v1211_v54  ;;  %2114 = vmatpush.msrb.mxu2 %v4427_v55  ;;  %v5170_v36 = vld [vmem:[#allocation25_spill] sm:$0xff] }
 0x1bf   : > { %2022 = vmatpush.msrb.mxu0 %v5169_v33  ;;  %v4444_v44 = vmul.f32 0.5, %v4366_v2  ;;  %v4447_v16 = vsub.f32 %v1768_v23, %v4427_v55  ;;  %vm1703_vm2 = vcmp.gt.f32.partialorder %v3625_v40, 0.0  ;;  %v1906_v41 = vsub.f32 %v4389_v50, %v1905_v17  ;;  %v5172_v2 = vld [vmem:[#allocation22_spill] sm:$0xff] }
 0x1c0   : > { %v5171_v24 = vand.u32 4294901760, %v5170_v36  ;;  %v1767_v13 = vsel %vm1703_vm2, %v1735_v34, 0.0  ;;  %v1350_v28 = vmul.f32 3.3333333, %v4399_v42  ;;  %v1542_v38 = vand.u32 2147483647, %v2681_v27 }
 0x1c1   : > { %vm1213_vm3 = vweird.f32 %v5172_v2  ;;  %v5112_v63 = vand.u32 4294901760, %v4447_v16  ;;  %v4459_v11 = vand.u32 4294901760, %v1767_v13  ;;  %2831 = vrsqrt.f32 %v4419_v53 }
 0x1c2   : > { %2026 = vmatpush.msrb.mxu0 %v5171_v24  ;;  %vm1702_vm4 = vcmp.gt.f32.partialorder %v3672_v14, 0.0  ;;  %v1445_v40 = vmul.f32 2.0, %v4440_v52  ;;  %vm1215_vm5 = vmor %vm1213_vm3, %vm1214_vm1  ;;  %v5174_v3 = vand.u32 4294901760, %v5173_v10  ;;  %v1574_v46 = vmul.f32 1.4285715, %v1542_v38  ;;  %v5177_v38 = vld [vmem:[#allocation30_spill] sm:$0xff] }
 0x1c3   : > { %v1907_v54 = vand.u32 4294901760, %v1906_v41  ;;  %v4469_v23 = vsel %vm1215_vm5, %v3849_v35, %v1212_v49  ;;  %v1201_v47 = vsub.f32 1.5, %v4184_v25  ;;  %v2157_v8 = vsub.f32 %v4447_v16, %v5112_v63  ;;  %2116 = vmatpush.msrb.mxu2 %v4459_v11  ;;  %v5179_v10 = vld [vmem:[#allocation29_spill] sm:$0xff]  ;;  %v5184_v63 = vld [vmem:[#allocation28_spill] sm:$0xff] }
 0x1c4   : > { %2030 = vmatpush.msrb.mxu0 %v5174_v3  ;;  %v4476_v4 = vsub.f32 %v1767_v13, %v4459_v11  ;;  %vm1318_vm6 = vcmp.lt.f32.partialorder %v4399_v42, 0.3  ;;  %v2648_v33 = vadd.f32 -1.0, %v1445_v40  ;;  %v5175_v34 = vand.u32 4294901760, %v3983_v15  ;;  %v5176_v13 = vld [vmem:[#allocation20_spill] sm:$0xff] }
 0x1c5   : > { %v2617_v27 = vadd.f32 -1.0, %v1350_v28  ;;  %vm1414_vm7 = vcmp.lt.f32.partialorder %v4399_v42, 1.0  ;;  %v1606_v35 = vsub.f32 1.0, %v1574_v46  ;;  %1908 = vmatpush.msra.mxu1 %v1907_v54  ;;  %v4485_v25 = vmul.f32 %v4469_v23, %v5172_v2 }
 0x1c6   : > { %2034 = vmatpush.msrb.mxu0 %v5175_v34  ;;  %v2158_v49 = vand.u32 4294901760, %v2157_v8  ;;  %v5111_v41 = vand.u32 4294901760, %v4476_v4  ;;  %v1349_v36 = vmul.f32 3.3333333, %v4440_v52  ;;  %v2680_v24 = vadd.f32 -0.3, %v2648_v33 }
 0x1c7   : > { %2077 = vmatpush.msrb.mxu1 %v5176_v13  ;;  %v5178_v15 = vand.u32 4294901760, %v5177_v38  ;;  %v1638_v28 = vsel %vm1414_vm7, %v1606_v35, 0.0  ;;  %vm1317_vm8 = vcmp.lt.f32.partialorder %v4440_v52, 0.3  ;;  %v1202_v40 = vmul.f32 %v4121_v6, %v1201_v47  ;;  %v4495_v3 = vpop.eup %2831  ;;  %v5180_v34 = vld [vmem:[#allocation17_spill] sm:$0xff]  ;;  %v526_v35 = vpop.permute.xlu1 %525 }
 0x1c8   : > { %vm1193_vm9 = vweird.f32 %v5179_v10  ;;  %2159 = vmatpush.msrb.mxu3 %v2158_v49  ;;  %v2163_v46 = vsub.f32 %v4476_v4, %v5111_v41  ;;  %v1670_v54 = vsel %vm1318_vm6, %v2617_v27, %v1638_v28  ;;  %v1541_v8 = vand.u32 2147483647, %v2680_v24  ;;  %v5181_v49 = vld [vmem:[#allocation32_spill] sm:$0xff]  ;;  %v2837_v28 = vld [vmem:[%s3020_s9 + $0x1] ss:$0 sm:$0xff] }
 0x1c9   : > { %2038 = vmatpush.msrb.mxu0 %v5178_v15  ;;  %v1444_v33 = vmul.f32 2.0, %v4485_v25  ;;  %2079 = vmatpush.msrb.mxu1 %v5180_v34  ;;  %v1734_v47 = vmul.f32 %v1670_v54, %v4392_v7  ;;  %vm1413_vm10 = vcmp.lt.f32.partialorder %v4440_v52, 1.0  ;;  %vm1701_vm11 = vcmp.gt.f32.partialorder %v3719_v62, 0.0  ;;  %v5183_v15 = vld [vmem:[#allocation21_spill] sm:$0xff] }
 0x1ca   : > { %vm1203_vm12 = vweird.f32 %v4073_v39  ;;  %vm1204_vm13 = vweird.f32 %v4121_v6  ;;  %v5182_v42 = vand.u32 4294901760, %v5181_v49  ;;  %v2164_v27 = vand.u32 4294901760, %v2163_v46 }
 0x1cb   : > { %v2616_v24 = vadd.f32 -1.0, %v1349_v36  ;;  %v1573_v13 = vmul.f32 1.4285715, %v1541_v8  ;;  %v2647_v38 = vadd.f32 -1.0, %v1444_v33  ;;  %2081 = vmatpush.msrb.mxu1 %v5183_v15  ;;  %vm1205_vm14 = vmor %vm1203_vm12, %vm1204_vm13  ;;  %v1766_v7 = vsel %vm1702_vm4, %v1734_v47, 0.0 }
 0x1cc   : > { %2042 = vmatpush.msrb.mxu0 %v5182_v42  ;;  %v601_v54 = vsub.f32 %v2837_v28, %v526_v35  ;;  %v4516_v34 = vsel %vm1205_vm14, %v4121_v6, %v1202_v40  ;;  %v1191_v41 = vsub.f32 1.5, %v4127_v31  ;;  %vm1183_vm15 = vweird.f32 %v5184_v63  ;;  %2165 = vmatpush.msrb.mxu3 %v2164_v27  ;;  %v5186_v35 = vld [vmem:[#allocation23_spill] sm:$0xff]  ;;  %v5187_v6 = vld [vmem:[#allocation33_spill] sm:$0xff] }
 0x1cd   : > { %v5185_v46 = vand.u32 4294901760, %v4111_v19  ;;  %v4522_v36 = vand.u32 4294901760, %v1766_v7  ;;  %v1605_v8 = vsub.f32 1.0, %v1573_v13  ;;  %v2679_v33 = vadd.f32 -0.3, %v2647_v38  ;;  %2083 = vmatpush.msrb.mxu1 %v5186_v35  ;;  %v5188_v40 = vld [vmem:[#allocation35_spill] sm:$0xff] }
 0x1ce   : > { %v4526_v14 = vmul.f32 %v4516_v34, %v4073_v39  ;;  %vm1316_vm0 = vcmp.lt.f32.partialorder %v4485_v25, 0.3  ;;  %v1192_v31 = vmul.f32 %v5187_v6, %v1191_v41  ;;  %vm1194_vm1 = vweird.f32 %v5187_v6  ;;  %v5190_v38 = vld [vmem:[#allocation24_spill] sm:$0xff]  ;;  %v5193_v35 = vld [vmem:[#allocation14_spill] sm:$0xff] }
 0x1cf   : > { %2046 = vmatpush.msrb.mxu0 %v5185_v46  ;;  %v1181_v19 = vsub.f32 1.5, %v5188_v40  ;;  %v5189_v47 = vand.u32 4294901760, %v4158_v58  ;;  %v4536_v49 = vsub.f32 %v1766_v7, %v4522_v36  ;;  %2118 = vmatpush.msrb.mxu2 %v4522_v36  ;;  %v1637_v42 = vsel %vm1413_vm10, %v1605_v8, 0.0  ;;  %vm1195_vm4 = vmor %vm1193_vm9, %vm1194_vm1 }
 0x1d0   : > { %v1348_v27 = vmul.f32 3.3333333, %v4485_v25  ;;  %v1540_v13 = vand.u32 2147483647, %v2679_v33  ;;  %2085 = vmatpush.msrb.mxu1 %v5190_v38  ;;  %v1669_v41 = vsel %vm1317_vm8, %v2616_v24, %v1637_v42  ;;  %vm1412_vm2 = vcmp.lt.f32.partialorder %v4485_v25, 1.0  ;;  %v5192_v24 = vld [vmem:[#allocation26_spill] sm:$0xff] }
 0x1d1   : > { %2050 = vmatpush.msrb.mxu0 %v5189_v47  ;;  %vm1700_vm3 = vcmp.gt.f32.partialorder %v5172_v2, 0.0  ;;  %v826_v58 = vmul.f32 %v601_v54, %v601_v54  ;;  %v1443_v15 = vmul.f32 2.0, %v4526_v14  ;;  %v5191_v7 = vand.u32 4294901760, %v4211_v45  ;;  %v5195_v42 = vld [vmem:[#allocation15_spill] sm:$0xff] }
 0x1d2   : > { %v2168_v28 = vand.u32 4294901760, %v4536_v49  ;;  %v1733_v46 = vmul.f32 %v1669_v41, %v4434_v29  ;;  %v1572_v8 = vmul.f32 1.4285715, %v1540_v13  ;;  %v4555_v52 = vsel %vm1195_vm4, %v5187_v6, %v1192_v31  ;;  %2087 = vmatpush.msrb.mxu1 %v5192_v24  ;;  %v5196_v38 = vld [vmem:[#allocation7_spill] sm:$0xff] }
 0x1d3   : > { %2054 = vmatpush.msrb.mxu0 %v5191_v7  ;;  %v2646_v33 = vadd.f32 -1.0, %v1443_v15  ;;  %v4560_v54 = vmul.f32 %v4555_v52, %v5179_v10  ;;  %v1182_v40 = vmul.f32 %v5193_v35, %v1181_v19  ;;  %vm1184_vm5 = vweird.f32 %v5193_v35  ;;  %v5200_v25 = vld [vmem:[#allocation31_spill] sm:$0xff] }
 0x1d4   : > { %v5194_v45 = vand.u32 4294901760, %v4258_v61  ;;  %v2169_v29 = vsub.f32 %v4536_v49, %v2168_v28  ;;  %v1765_v6 = vsel %vm1701_vm11, %v1733_v46, 0.0  ;;  %v2615_v31 = vadd.f32 -1.0, %v1348_v27  ;;  %2089 = vmatpush.msrb.mxu1 %v5195_v42  ;;  %vm1185_vm7 = vmor %vm1183_vm15, %vm1184_vm5 }
 0x1d5   : > { %v1604_v47 = vsub.f32 1.0, %v1572_v8  ;;  %v4572_v13 = vand.u32 4294901760, %v1765_v6  ;;  %v4575_v19 = vadd.f32 %v826_v58, %v5196_v38  ;;  %vm1315_vm6 = vcmp.lt.f32.partialorder %v4526_v14, 0.3  ;;  %v5198_v58 = vld [vmem:[#allocation6_spill] sm:$0xff] }
 0x1d6   : > { %2058 = vmatpush.msrb.mxu0 %v5194_v45  ;;  %v1347_v61 = vmul.f32 3.3333333, %v4526_v14  ;;  %v2678_v41 = vadd.f32 -0.3, %v2646_v33  ;;  %v5197_v15 = vand.u32 4294901760, %v4287_v43  ;;  %v2170_v7 = vand.u32 4294901760, %v2169_v29  ;;  %2091 = vmatpush.msrb.mxu1 %v5198_v58 }
 0x1d7   : > { %v1636_v62 = vsel %vm1412_vm2, %v1604_v47, 0.0  ;;  %v1346_v27 = vmul.f32 3.3333333, %v4560_v54  ;;  %v1442_v46 = vmul.f32 2.0, %v4560_v54  ;;  %v4591_v8 = vsub.f32 %v1765_v6, %v4572_v13  ;;  %2120 = vmatpush.msrb.mxu2 %v4572_v13  ;;  %v5201_v38 = vld [vmem:[#allocation34_spill] sm:$0xff] }
 0x1d8   : > { %2062 = vmatpush.msrb.mxu0 %v5197_v15  ;;  %v1668_v43 = vsel %vm1316_vm0, %v2615_v31, %v1636_v62  ;;  %v1539_v24 = vand.u32 2147483647, %v2678_v41  ;;  %v4597_v33 = vsel %vm1185_vm7, %v5193_v35, %v1182_v40  ;;  %v5199_v45 = vand.u32 4294901760, %v4348_v37  ;;  %2171 = vmatpush.msrb.mxu3 %v2170_v7  ;;  %v687_v7 = vpop.permute.xlu1 %686 }
 0x1d9   : > { %v1732_v29 = vmul.f32 %v1668_v43, %v4469_v23  ;;  %vm1411_vm8 = vcmp.lt.f32.partialorder %v4526_v14, 1.0  ;;  %vm1699_vm9 = vcmp.gt.f32.partialorder %v4073_v39, 0.0  ;;  %v2645_v6 = vadd.f32 -1.0, %v1442_v46  ;;  %2093 = vmatpush.msrb.mxu1 %v5200_v25  ;;  %v1770_v14 = vld [vmem:[%s5053_s2] sm:$0xff] }
 0x1da   : > { %2066 = vmatpush.msrb.mxu0 %v5199_v45  ;;  %v4606_v47 = vmul.f32 %v4597_v33, %v5184_v63  ;;  %v2174_v35 = vand.u32 4294901760, %v4591_v8  ;;  %v2614_v40 = vadd.f32 -1.0, %v1347_v61  ;;  %v1571_v31 = vmul.f32 1.4285715, %v1539_v24 }
 0x1db   : > { %v1169_v37 = vmul.f32 %v4213_v5, %v4234_v59  ;;  %v1764_v23 = vsel %vm1700_vm3, %v1732_v29, 0.0  ;;  %vm1314_vm10 = vcmp.lt.f32.partialorder %v4560_v54, 0.3  ;;  %vm1410_vm11 = vcmp.lt.f32.partialorder %v4560_v54, 1.0  ;;  %2095 = vmatpush.msrb.mxu1 %v5201_v38  ;;  %v5202_v29 = vld [vmem:[#allocation10_spill] sm:$0xff] }
 0x1dc   : > { %2070 = vmatpush.msrb.mxu0 %v1905_v17  ;;  %v2677_v42 = vadd.f32 -0.3, %v2645_v6  ;;  %v2175_v61 = vsub.f32 %v4591_v8, %v2174_v35  ;;  %v4622_v41 = vand.u32 4294901760, %v1764_v23  ;;  %v1603_v59 = vsub.f32 1.0, %v1571_v31  ;;  %v2838_v31 = vld [vmem:[%s3020_s9 + $0x2] ss:$0 sm:$0xff] }
 0x1dd   : > { %v2613_v15 = vadd.f32 -1.0, %v1346_v27  ;;  %v1441_v17 = vmul.f32 2.0, %v4606_v47  ;;  %v1170_v2 = vmul.f32 0.5, %v1169_v37  ;;  %vm1173_vm12 = vweird.f32 %v4164_v26  ;;  %2097 = vmatpush.msrb.mxu1 %v4143_v48 }
 0x1de   : > { %v1538_v50 = vand.u32 2147483647, %v2677_v42  ;;  %v2176_v62 = vand.u32 4294901760, %v2175_v61  ;;  %v4628_v46 = vsub.f32 %v1764_v23, %v4622_v41  ;;  %2122 = vmatpush.msrb.mxu2 %v4622_v41  ;;  %v1635_v58 = vsel %vm1411_vm8, %v1603_v59, 0.0 }
 0x1df   : > { %vm1174_vm13 = vweird.f32 %v4213_v5  ;;  %v1667_v27 = vsel %vm1315_vm6, %v2614_v40, %v1635_v58  ;;  %v2644_v24 = vadd.f32 -1.0, %v1441_v17  ;;  %v1171_v45 = vsub.f32 1.5, %v1170_v2  ;;  %2099 = vmatpush.msrb.mxu1 %v5202_v29 }
 0x1e0   : > { %v1570_v43 = vmul.f32 1.4285715, %v1538_v50  ;;  %2177 = vmatpush.msrb.mxu3 %v2176_v62  ;;  %v2180_v48 = vand.u32 4294901760, %v4628_v46  ;;  %v1731_v6 = vmul.f32 %v1667_v27, %v4516_v34  ;;  %v1345_v25 = vmul.f32 3.3333333, %v4606_v47  ;;  %vm1175_vm14 = vmor %vm1173_vm12, %vm1174_vm13 }
 0x1e1   : > { %v762_v37 = vsub.f32 %v2838_v31, %v687_v7  ;;  %v2676_v42 = vadd.f32 -0.3, %v2644_v24  ;;  %v1172_v38 = vmul.f32 %v4213_v5, %v1171_v45  ;;  %2101 = vmatpush.msrb.mxu1 %v4249_v51  ;;  %v1161_v40 = vsub.f32 1.5, %v4362_v9 }
 0x1e2   : > { %v1602_v23 = vsub.f32 1.0, %v1570_v43  ;;  %v2181_v34 = vsub.f32 %v4628_v46, %v2180_v48  ;;  %v1763_v61 = vsel %vm1699_vm9, %v1731_v6, 0.0  ;;  %v4656_v50 = vand.u32 4294901760, %v1770_v14 }
 0x1e3   : > { %v890_v59 = vmul.f32 %v762_v37, %v762_v37  ;;  %v4658_v17 = vand.u32 4294901760, %v1763_v61  ;;  %v1537_v9 = vand.u32 2147483647, %v2676_v42  ;;  %v4663_v2 = vsel %vm1175_vm14, %v4213_v5, %v1172_v38  ;;  %2103 = vmatpush.msrb.mxu1 %v4268_v60 }
 0x1e4   : > { %v1634_v51 = vsel %vm1410_vm11, %v1602_v23, 0.0  ;;  %v2182_v39 = vand.u32 4294901760, %v2181_v34  ;;  %v4670_v62 = vmul.f32 %v4663_v2, %v4164_v26  ;;  %1910 = vmatmul.f32.vlgmr.msra.gmra.mxu1 %v4656_v50  ;;  %v1805_v54 = vsub.f32 %v1770_v14, %v4656_v50 }
 0x1e5   : > { %v1666_v7 = vsel %vm1314_vm10, %v2613_v15, %v1634_v51  ;;  %v4673_v58 = vadd.f32 %v890_v59, %v4575_v19  ;;  %2124 = vmatpush.msrb.mxu2 %v4658_v17  ;;  %v4679_v27 = vsub.f32 %v1763_v61, %v4658_v17  ;;  %v1569_v60 = vmul.f32 1.4285715, %v1537_v9  ;;  %2105 = vmatpush.msrb.mxu1 %v4337_v57 }
 0x1e6   : > { %v1730_v5 = vmul.f32 %v1666_v7, %v4555_v52  ;;  %2183 = vmatpush.msrb.mxu3 %v2182_v39  ;;  %vm1698_vm15 = vcmp.gt.f32.partialorder %v5179_v10, 0.0  ;;  %vm1409_vm0 = vcmp.lt.f32.partialorder %v4606_v47, 1.0  ;;  %vm1697_vm1 = vcmp.gt.f32.partialorder %v5184_v63, 0.0  ;;  %1964 = vmatmul.f32.vlgmr.msra.gmra.mxu2 %v1805_v54 }
 0x1e7   : > { %v1440_v19 = vmul.f32 2.0, %v4670_v62  ;;  %v2186_v52 = vand.u32 4294901760, %v4679_v27  ;;  %v2612_v43 = vadd.f32 -1.0, %v1345_v25  ;;  %v1601_v24 = vsub.f32 1.0, %v1569_v60  ;;  %2107 = vmatpush.msrb.mxu1 %v4380_v30 }
 0x1e8   : > { %v1762_v15 = vsel %vm1698_vm15, %v1730_v5, 0.0  ;;  %2833 = vrsqrt.f32 %v4673_v58  ;;  %v1806_v10 = vand.u32 4294901760, %v1805_v54  ;;  %vm1313_vm2 = vcmp.lt.f32.partialorder %v4606_v47, 0.3 }
 0x1e9   : > { %v4689_v45 = vand.u32 4294901760, %v1762_v15  ;;  %v2643_v57 = vadd.f32 -1.0, %v1440_v19  ;;  %2310 = vmatpush.msra.mxu1 %v4427_v55  ;;  %v2187_v29 = vsub.f32 %v4679_v27, %v2186_v52  ;;  %v1633_v6 = vsel %vm1409_vm0, %v1601_v24, 0.0  ;;  %v5203_v19 = vld [vmem:[#allocation11_spill] sm:$0xff] }
 0x1ea   : > { %v1162_v30 = vmul.f32 %v4290_v32, %v1161_v40  ;;  %v1665_v25 = vsel %vm1313_vm2, %v2612_v43, %v1633_v6  ;;  %v1807_v23 = vsub.f32 %v1805_v54, %v1806_v10  ;;  %vm1163_vm3 = vweird.f32 %v4241_v1  ;;  %2003 = vmatmul.f32.vlgmr.msra.gmra.mxu3 %v1806_v10 }
 0x1eb   : > { %2126 = vmatpush.msrb.mxu2 %v4689_v45  ;;  %v4702_v31 = vsub.f32 %v1762_v15, %v4689_v45  ;;  %v2675_v37 = vadd.f32 -0.3, %v2643_v57  ;;  %2312 = vmatpush.msra.mxu1 %v4459_v11  ;;  %v2188_v42 = vand.u32 4294901760, %v2187_v29  ;;  %v1729_v38 = vmul.f32 %v1665_v25, %v4597_v33  ;;  %v5204_v15 = vld [vmem:[#allocation9_spill] sm:$0xff] }
 0x1ec   : > { %vm1164_vm4 = vweird.f32 %v4290_v32  ;;  %v1808_v40 = vand.u32 4294901760, %v1807_v23  ;;  %v1151_v34 = vsub.f32 1.5, %v4444_v44  ;;  %v1129_v61 = vmul.f32 %v4310_v18, %v4334_v21  ;;  %2109 = vmatmul.f32.vlgmr.msrb.gmra.mxu1 %v4656_v50 }
 0x1ed   : > { %v2192_v47 = vand.u32 4294901760, %v4702_v31  ;;  %v1536_v14 = vand.u32 2147483647, %v2675_v37  ;;  %vm1165_vm5 = vmor %vm1163_vm3, %vm1164_vm4  ;;  %2314 = vmatpush.msra.mxu1 %v4522_v36  ;;  %2189 = vmatpush.msrb.mxu3 %v2188_v42  ;;  %v1761_v33 = vsel %vm1697_vm1, %v1729_v38, 0.0  ;;  %v1344_v59 = vmul.f32 3.3333333, %v4670_v62 }
 0x1ee   : > { %v4717_v51 = vsel %vm1165_vm5, %v4290_v32, %v1162_v30  ;;  %v4720_v9 = vpop.eup %2833  ;;  %v4722_v39 = vand.u32 4294901760, %v1761_v33  ;;  %1809 = vmatmul.f32.vlgmr.msra.gmra.mxu0 %v1808_v40  ;;  %vm1154_vm6 = vweird.f32 %v4327_v22  ;;  %v1099_v32 = vmul.f32 %v4373_v20, %v4404_v0 }
 0x1ef   : > { %v2193_v44 = vsub.f32 %v4702_v31, %v2192_v47  ;;  %v1568_v21 = vmul.f32 1.4285715, %v1536_v14  ;;  %2316 = vmatpush.msra.mxu1 %v4572_v13  ;;  %2257 = vmatpush.msra.mxu0 %v4447_v16  ;;  %v4734_v63 = vmul.f32 %v4717_v51, %v4241_v1  ;;  %v1152_v7 = vmul.f32 %v4327_v22, %v1151_v34 }
 0x1f0   : > { %vm1153_vm7 = vweird.f32 %v4272_v12  ;;  %2128 = vmatpush.msrb.mxu2 %v4722_v39  ;;  %v4740_v54 = vsub.f32 %v1761_v33, %v4722_v39  ;;  %v1139_v0 = vmul.f32 %v5204_v15, %v5203_v19  ;;  %v2611_v43 = vadd.f32 -1.0, %v1344_v59 }
 0x1f1   : > { %v2194_v5 = vand.u32 4294901760, %v2193_v44  ;;  %v1600_v60 = vsub.f32 1.0, %v1568_v21  ;;  %2318 = vmatpush.msra.mxu1 %v4622_v41  ;;  %vm1408_vm8 = vcmp.lt.f32.partialorder %v4670_v62, 1.0  ;;  %v1108_v24 = vmul.f32 %v4720_v9, %v4673_v58  ;;  %2260 = vmatpush.msra.mxu0 %v4476_v4  ;;  %vm1155_vm9 = vmor %vm1153_vm7, %vm1154_vm6 }
 0x1f2   : > { %v1439_v57 = vmul.f32 2.0, %v4734_v63  ;;  %vm1312_vm10 = vcmp.lt.f32.partialorder %v4670_v62, 0.3  ;;  %v2198_v29 = vand.u32 4294901760, %v4740_v54  ;;  %v4755_v6 = vsel %vm1155_vm9, %v4327_v22, %v1152_v7  ;;  %v5205_v7 = vld [vmem:[#allocation8_spill] sm:$0xff] }
 0x1f3   : > { %2195 = vmatpush.msrb.mxu3 %v2194_v5  ;;  %v1632_v10 = vsel %vm1408_vm8, %v1600_v60, 0.0  ;;  %2320 = vmatpush.msra.mxu1 %v4658_v17  ;;  %v1130_v30 = vmul.f32 0.5, %v1129_v61  ;;  %v4761_v23 = vmul.f32 %v4755_v6, %v4272_v12  ;;  %v4763_v42 = vmul.f32 0.5, %v1099_v32 }
 0x1f4   : > { %v1664_v25 = vsel %vm1312_vm10, %v2611_v43, %v1632_v10  ;;  %v2642_v37 = vadd.f32 -1.0, %v1439_v57  ;;  %2263 = vmatpush.msra.mxu0 %v4536_v49  ;;  %v2199_v22 = vsub.f32 %v4740_v54, %v2198_v29  ;;  %v1140_v38 = vmul.f32 0.5, %v1139_v0 }
 0x1f5   : > { %v1728_v62 = vmul.f32 %v1664_v25, %v4663_v2  ;;  %2322 = vmatpush.msra.mxu1 %v4689_v45  ;;  %v1118_v14 = vmul.f32 %v4495_v3, %v4419_v53  ;;  %vm1696_vm11 = vcmp.gt.f32.partialorder %v4164_v26, 0.0  ;;  %v1109_v40 = vmul.f32 %v4720_v9, %v1108_v24  ;;  %v5206_v24 = vld [vmem:[#allocation13_spill] sm:$0xff] }
 0x1f6   : > { %v2674_v34 = vadd.f32 -0.3, %v2642_v37  ;;  %2266 = vmatpush.msra.mxu0 %v4591_v8  ;;  %v2200_v33 = vand.u32 4294901760, %v2199_v22  ;;  %v1343_v2 = vmul.f32 3.3333333, %v4734_v63  ;;  %v1438_v59 = vmul.f32 2.0, %v4761_v23 }
 0x1f7   : > { %v1760_v61 = vsel %vm1696_vm11, %v1728_v62, 0.0  ;;  %2324 = vmatpush.msra.mxu1 %v4722_v39  ;;  %2072 = vmatmul.f32.vlgmr.msrb.gmra.mxu0 %v4656_v50  ;;  %v1141_v26 = vsub.f32 1.5, %v1140_v38  ;;  %vm1144_vm12 = vweird.f32 %v5204_v15  ;;  %vm1407_vm13 = vcmp.lt.f32.partialorder %v4734_v63, 1.0 }
 0x1f8   : > { %v4779_v44 = vand.u32 4294901760, %v1760_v61  ;;  %v1535_v21 = vand.u32 2147483647, %v2674_v34  ;;  %2269 = vmatpush.msra.mxu0 %v4628_v46  ;;  %2201 = vmatpush.msrb.mxu3 %v2200_v33  ;;  %vm1695_vm14 = vcmp.gt.f32.partialorder %v4241_v1, 0.0  ;;  %v2641_v32 = vadd.f32 -1.0, %v1438_v59 }
 0x1f9   : > { %vm1143_vm15 = vweird.f32 %v5205_v7  ;;  %v1131_v5 = vsub.f32 1.5, %v1130_v30  ;;  %v1142_v19 = vmul.f32 %v5204_v15, %v1141_v26  ;;  %vm1134_vm0 = vweird.f32 %v4310_v18 }
 0x1fa   : > { %2130 = vmatpush.msrb.mxu2 %v4779_v44  ;;  %v4788_v50 = vsub.f32 %v1760_v61, %v4779_v44  ;;  %v1567_v60 = vmul.f32 1.4285715, %v1535_v21  ;;  %2272 = vmatpush.msra.mxu0 %v4679_v27  ;;  %v2673_v0 = vadd.f32 -0.3, %v2641_v32  ;;  %vm1145_vm1 = vmor %vm1143_vm15, %vm1144_vm12  ;;  %vm1133_vm2 = vweird.f32 %v5206_v24 }
 0x1fb   : > { %v1132_v43 = vmul.f32 %v4310_v18, %v1131_v5  ;;  %v1119_v57 = vmul.f32 %v4495_v3, %v1118_v14  ;;  %2326 = vmatpush.msra.mxu1 %v4779_v44  ;;  %v2610_v30 = vadd.f32 -1.0, %v1343_v2  ;;  %v4799_v37 = vsel %vm1145_vm1, %v5204_v15, %v1142_v19  ;;  %vm1135_vm3 = vmor %vm1133_vm2, %vm1134_vm0 }
 0x1fc   : > { %v2204_v10 = vand.u32 4294901760, %v4788_v50  ;;  %v1599_v25 = vsub.f32 1.0, %v1567_v60  ;;  %2275 = vmatpush.msra.mxu0 %v4702_v31  ;;  %v1342_v62 = vmul.f32 3.3333333, %v4761_v23  ;;  %v1534_v22 = vand.u32 2147483647, %v2673_v0 }
 0x1fd   : > { %v4805_v38 = vmul.f32 %v4799_v37, %v5205_v7  ;;  %v4808_v14 = vsel %vm1135_vm3, %v4310_v18, %v1132_v43  ;;  %vm1311_vm4 = vcmp.lt.f32.partialorder %v4734_v63, 0.3  ;;  %vm1694_vm5 = vcmp.gt.f32.partialorder %v4272_v12, 0.0 }
 0x1fe   : > { %v2205_v34 = vsub.f32 %v4788_v50, %v2204_v10  ;;  %v1631_v15 = vsel %vm1407_vm13, %v1599_v25, 0.0  ;;  %v4818_v61 = vmul.f32 %v4808_v14, %v5206_v24  ;;  %2278 = vmatpush.msra.mxu0 %v4740_v54  ;;  %v1566_v2 = vmul.f32 1.4285715, %v1534_v22 }
 0x1ff   : > { %v1663_v33 = vsel %vm1311_vm4, %v2610_v30, %v1631_v15  ;;  %v1120_v18 = vmul.f32 0.5, %v1119_v57  ;;  %v1110_v59 = vmul.f32 0.5, %v1109_v40  ;;  %v1437_v32 = vmul.f32 2.0, %v4805_v38 }
 0x200   : > { %v2206_v21 = vand.u32 4294901760, %v2205_v34  ;;  %v1727_v26 = vmul.f32 %v1663_v33, %v4717_v51  ;;  %2281 = vmatpush.msra.mxu0 %v4788_v50  ;;  %vm1310_vm6 = vcmp.lt.f32.partialorder %v4761_v23, 0.3  ;;  %v2609_v63 = vadd.f32 -1.0, %v1342_v62  ;;  %v2460_v50 = vld [vmem:[%s3020_s9] sm:$0x7] }
 0x201   : > { %vm1406_vm7 = vcmp.lt.f32.partialorder %v4761_v23, 1.0  ;;  %v1598_v5 = vsub.f32 1.0, %v1566_v2  ;;  %v2640_v19 = vadd.f32 -1.0, %v1437_v32  ;;  %v1436_v40 = vmul.f32 2.0, %v4818_v61 }
 0x202   : > { %2207 = vmatpush.msrb.mxu3 %v2206_v21  ;;  %v1759_v60 = vsel %vm1695_vm14, %v1727_v26, 0.0  ;;  %vm1123_vm8 = vweird.f32 %v4419_v53  ;;  %v1121_v43 = vsub.f32 1.5, %v1120_v18  ;;  %vm1124_vm9 = vweird.f32 %v4495_v3 }
 0x203   : > { %v4831_v51 = vand.u32 4294901760, %v1759_v60  ;;  %v1630_v0 = vsel %vm1406_vm7, %v1598_v5, 0.0  ;;  %vm1309_vm10 = vcmp.lt.f32.partialorder %v4805_v38, 0.3  ;;  %v2672_v23 = vadd.f32 -0.3, %v2640_v19  ;;  %vm1125_vm12 = vmor %vm1123_vm8, %vm1124_vm9 }
 0x204   : > { %v1662_v57 = vsel %vm1310_vm6, %v2609_v63, %v1630_v0  ;;  %v2639_v30 = vadd.f32 -1.0, %v1436_v40  ;;  %v1341_v62 = vmul.f32 3.3333333, %v4805_v38  ;;  %v1122_v22 = vmul.f32 %v4495_v3, %v1121_v43 }
 0x205   : > { %2132 = vmatpush.msrb.mxu2 %v4831_v51  ;;  %v1726_v1 = vmul.f32 %v1662_v57, %v4755_v6  ;;  %v4838_v25 = vsub.f32 %v1759_v60, %v4831_v51  ;;  %2328 = vmatpush.msra.mxu1 %v4831_v51  ;;  %vm1405_vm11 = vcmp.lt.f32.partialorder %v4805_v38, 1.0  ;;  %v1533_v34 = vand.u32 2147483647, %v2672_v23 }
 0x206   : > { %v2671_v15 = vadd.f32 -0.3, %v2639_v30  ;;  %v1111_v33 = vsub.f32 1.5, %v1110_v59  ;;  %v4851_v18 = vsel %vm1125_vm12, %v4495_v3, %v1122_v22  ;;  %vm1114_vm13 = vweird.f32 %v4720_v9 }
 0x207   : > { %v1758_v6 = vsel %vm1694_vm5, %v1726_v1, 0.0  ;;  %v2210_v2 = vand.u32 4294901760, %v4838_v25  ;;  %2284 = vmatpush.msra.mxu0 %v4838_v25  ;;  %v1565_v26 = vmul.f32 1.4285715, %v1533_v34  ;;  %v4858_v63 = vmul.f32 %v4851_v18, %v4419_v53 }
 0x208   : > { %v4854_v21 = vand.u32 4294901760, %v1758_v6  ;;  %v1532_v32 = vand.u32 2147483647, %v2671_v15  ;;  %v2608_v59 = vadd.f32 -1.0, %v1341_v62  ;;  %v1340_v5 = vmul.f32 3.3333333, %v4818_v61 }
 0x209   : > { %v2211_v12 = vsub.f32 %v4838_v25, %v2210_v2  ;;  %v1112_v3 = vmul.f32 %v4720_v9, %v1111_v33  ;;  %v1597_v60 = vsub.f32 1.0, %v1565_v26  ;;  %vm1113_vm14 = vweird.f32 %v4673_v58 }
 0x20a   : > { %2134 = vmatpush.msrb.mxu2 %v4854_v21  ;;  %v1564_v19 = vmul.f32 1.4285715, %v1532_v32  ;;  %v4867_v40 = vsub.f32 %v1758_v6, %v4854_v21  ;;  %2330 = vmatpush.msra.mxu1 %v4854_v21  ;;  %vm1404_vm15 = vcmp.lt.f32.partialorder %v4818_v61, 1.0  ;;  %v1435_v43 = vmul.f32 2.0, %v4858_v63  ;;  %vm1115_vm0 = vmor %vm1113_vm14, %vm1114_vm13 }
 0x20b   : > { %v2212_v0 = vand.u32 4294901760, %v2211_v12  ;;  %v1101_v57 = vsub.f32 1.5, %v4763_v42  ;;  %v1629_v23 = vsel %vm1405_vm11, %v1597_v60, 0.0  ;;  %v4881_v62 = vsel %vm1115_vm0, %v4720_v9, %v1112_v3 }
 0x20c   : > { %v1596_v30 = vsub.f32 1.0, %v1564_v19  ;;  %v2216_v1 = vand.u32 4294901760, %v4867_v40  ;;  %2287 = vmatpush.msra.mxu0 %v4867_v40  ;;  %v1661_v22 = vsel %vm1309_vm10, %v2608_v59, %v1629_v23  ;;  %v2607_v34 = vadd.f32 -1.0, %v1340_v5 }
 0x20d   : > { %2213 = vmatpush.msrb.mxu3 %v2212_v0  ;;  %v2638_v15 = vadd.f32 -1.0, %v1435_v43  ;;  %v4887_v42 = vmul.f32 %v4881_v62, %v4673_v58  ;;  %v1725_v33 = vmul.f32 %v1661_v22, %v4799_v37  ;;  %vm1308_vm1 = vcmp.lt.f32.partialorder %v4818_v61, 0.3 }
 0x20e   : > { %v1628_v6 = vsel %vm1404_vm15, %v1596_v30, 0.0  ;;  %v2217_v9 = vsub.f32 %v4867_v40, %v2216_v1  ;;  %vm1693_vm2 = vcmp.gt.f32.partialorder %v5205_v7, 0.0  ;;  %v1102_v5 = vmul.f32 %v4373_v20, %v1101_v57 }
 0x20f   : > { %v1660_v38 = vsel %vm1308_vm1, %v2607_v34, %v1628_v6  ;;  %v2670_v26 = vadd.f32 -0.3, %v2638_v15  ;;  %v1757_v32 = vsel %vm1693_vm2, %v1725_v33, 0.0  ;;  %vm1692_vm3 = vcmp.gt.f32.partialorder %v5206_v24, 0.0 }
 0x210   : > { %v1724_v12 = vmul.f32 %v1660_v38, %v4808_v14  ;;  %v2218_v59 = vand.u32 4294901760, %v2217_v9  ;;  %v4899_v37 = vand.u32 4294901760, %v1757_v32  ;;  %v1434_v3 = vmul.f32 2.0, %v4887_v42 }
 0x211   : > { %v1531_v61 = vand.u32 2147483647, %v2670_v26  ;;  %v1339_v19 = vmul.f32 3.3333333, %v4858_v63  ;;  %vm1103_vm4 = vweird.f32 %v4319_v56  ;;  %vm1104_vm5 = vweird.f32 %v4373_v20 }
 0x212   : > { %v1756_v60 = vsel %vm1692_vm3, %v1724_v12, 0.0  ;;  %2219 = vmatpush.msrb.mxu3 %v2218_v59  ;;  %2136 = vmatpush.msrb.mxu2 %v4899_v37  ;;  %v4910_v14 = vsub.f32 %v1757_v32, %v4899_v37  ;;  %v2637_v24 = vadd.f32 -1.0, %v1434_v3  ;;  %vm1105_vm6 = vmor %vm1103_vm4, %vm1104_vm5  ;;  %vm1307_vm7 = vcmp.lt.f32.partialorder %v4858_v63, 0.3 }
 0x213   : > { %v4907_v7 = vand.u32 4294901760, %v1756_v60  ;;  %v1563_v0 = vmul.f32 1.4285715, %v1531_v61  ;;  %2332 = vmatpush.msra.mxu1 %v4899_v37  ;;  %v4914_v43 = vsel %vm1105_vm6, %v4373_v20, %v1102_v5  ;;  %v2606_v34 = vadd.f32 -1.0, %v1339_v19 }
 0x214   : > { %v2222_v57 = vand.u32 4294901760, %v4910_v14  ;;  %2290 = vmatpush.msra.mxu0 %v4910_v14  ;;  %v2669_v22 = vadd.f32 -0.3, %v2637_v24  ;;  %vm1403_vm8 = vcmp.lt.f32.partialorder %v4858_v63, 1.0  ;;  %v1273_v20 = vmul.f32 %v4914_v43, %v4319_v56  ;;  %v1771_v63 = vld [vmem:[%s5053_s2 + $0x8] sm:$0xff] }
 0x215   : > { %2138 = vmatpush.msrb.mxu2 %v4907_v7  ;;  %v1595_v23 = vsub.f32 1.0, %v1563_v0  ;;  %v4919_v30 = vsub.f32 %v1756_v60, %v4907_v7  ;;  %2334 = vmatpush.msra.mxu1 %v4907_v7  ;;  %v1338_v26 = vmul.f32 3.3333333, %v4887_v42  ;;  %vm1691_vm9 = vcmp.gt.f32.partialorder %v4419_v53, 0.0 }
 0x216   : > { %v2223_v15 = vsub.f32 %v4910_v14, %v2222_v57  ;;  %v1530_v9 = vand.u32 2147483647, %v2669_v22  ;;  %v1433_v61 = vmul.f32 2.0, %v1273_v20  ;;  %v4941_v0 = vand.u32 4294901760, %v1771_v63 }
 0x217   : > { %v1627_v33 = vsel %vm1403_vm8, %v1595_v23, 0.0  ;;  %v2228_v6 = vand.u32 4294901760, %v4919_v30  ;;  %2293 = vmatpush.msra.mxu0 %v4919_v30  ;;  %v2605_v23 = vadd.f32 -1.0, %v1338_v26  ;;  %vm1402_vm10 = vcmp.lt.f32.partialorder %v4887_v42, 1.0 }
 0x218   : > { %v1659_v38 = vsel %vm1307_vm7, %v2606_v34, %v1627_v33  ;;  %v2224_v32 = vand.u32 4294901760, %v2223_v15  ;;  %v1562_v5 = vmul.f32 1.4285715, %v1530_v9  ;;  %vm1306_vm11 = vcmp.lt.f32.partialorder %v4887_v42, 0.3 }
 0x219   : > { %v1723_v12 = vmul.f32 %v1659_v38, %v4851_v18  ;;  %v2229_v59 = vsub.f32 %v4919_v30, %v2228_v6  ;;  %v2636_v18 = vadd.f32 -1.0, %v1433_v61  ;;  %v2146_v9 = vsub.f32 %v1771_v63, %v4941_v0 }
 0x21a   : > { %2225 = vmatpush.msrb.mxu3 %v2224_v32  ;;  %v1594_v19 = vsub.f32 1.0, %v1562_v5  ;;  %vm1690_vm12 = vcmp.gt.f32.partialorder %v4673_v58, 0.0  ;;  %v1337_v32 = vmul.f32 3.3333333, %v1273_v20  ;;  %vm1401_vm13 = vcmp.lt.f32.partialorder %v1273_v20, 1.0 }
 0x21b   : > { %v1755_v3 = vsel %vm1691_vm9, %v1723_v12, 0.0  ;;  %v2230_v60 = vand.u32 4294901760, %v2229_v59  ;;  %v2668_v15 = vadd.f32 -0.3, %v2636_v18  ;;  %v2147_v61 = vand.u32 4294901760, %v2146_v9 }
 0x21c   : > { %v4943_v24 = vand.u32 4294901760, %v1755_v3  ;;  %v1626_v22 = vsel %vm1402_vm10, %v1594_v19, 0.0  ;;  %v2604_v58 = vadd.f32 -1.0, %v1337_v32  ;;  %vm1305_vm14 = vcmp.lt.f32.partialorder %v1273_v20, 0.3 }
 0x21d   : > { %2231 = vmatpush.msrb.mxu3 %v2230_v60  ;;  %v1658_v34 = vsel %vm1306_vm11, %v2605_v23, %v1626_v22  ;;  %v1529_v42 = vand.u32 2147483647, %v2668_v15  ;;  %v2148_v18 = vsub.f32 %v2146_v9, %v2147_v61  ;;  %vm1689_vm15 = vcmp.gt.f32.partialorder %v4319_v56, 0.0 }
 0x21e   : > { %2140 = vmatpush.msrb.mxu2 %v4943_v24  ;;  %v4949_v53 = vsub.f32 %v1755_v3, %v4943_v24  ;;  %2336 = vmatpush.msra.mxu1 %v4943_v24  ;;  %v1722_v33 = vmul.f32 %v1658_v34, %v4881_v62  ;;  %v5207_v20 = vand.u32 4294901760, %v4447_v16 }
 0x21f   : > { %v1561_v5 = vmul.f32 1.4285715, %v1529_v42 }
 0x220   : > { %2296 = vmatpush.msra.mxu0 %v4949_v53  ;;  %v2234_v38 = vand.u32 4294901760, %v4949_v53  ;;  %v1754_v26 = vsel %vm1690_vm12, %v1722_v33, 0.0 }
 0x221   : > { %v4960_v59 = vand.u32 4294901760, %v1754_v26  ;;  %v1593_v63 = vsub.f32 1.0, %v1561_v5 }
 0x222   : > { %v2235_v12 = vsub.f32 %v4949_v53, %v2234_v38 }
 0x223   : > { %2142 = vmatpush.msrb.mxu2 %v4960_v59  ;;  %2338 = vmatpush.msra.mxu1 %v4960_v59  ;;  %v2239_v3 = vsub.f32 %v1754_v26, %v4960_v59  ;;  %v1625_v60 = vsel %vm1401_vm13, %v1593_v63, 0.0 }
 0x224   : > { %v2236_v62 = vand.u32 4294901760, %v2235_v12  ;;  %v1657_v23 = vsel %vm1305_vm14, %v2604_v58, %v1625_v60  ;;  %v2149_v12 = vand.u32 4294901760, %v2148_v18 }
 0x225   : > { %2299 = vmatpush.msra.mxu0 %v2239_v3  ;;  %v2240_v19 = vand.u32 4294901760, %v2239_v3  ;;  %v1721_v22 = vmul.f32 %v1657_v23, %v4914_v43  ;;  %v5208_v43 = vand.u32 4294901760, %v4476_v4 }
 0x226   : > { %2237 = vmatpush.msrb.mxu3 %v2236_v62 }
 0x227   : > { %v2241_v34 = vsub.f32 %v2239_v3, %v2240_v19  ;;  %v1753_v15 = vsel %vm1689_vm15, %v1721_v22, 0.0 }
 0x228   : > { %v2143_v42 = vand.u32 4294901760, %v1753_v15 }
 0x229   : > { %v2242_v33 = vand.u32 4294901760, %v2241_v34 }
 0x22a   : > { %2144 = vmatpush.msrb.mxu2 %v2143_v42  ;;  %2340 = vmatpush.msra.mxu1 %v2143_v42  ;;  %v2245_v26 = vsub.f32 %v1753_v15, %v2143_v42 }
 0x22b   : > { %2243 = vmatpush.msrb.mxu3 %v2242_v33  ;;  %2344 = vmatmul.f32.vlgmr.msra.gmra.mxu1 %v2147_v61 }
 0x22c   : > { %2351 = vmatpush.msra.mxu2 %v5207_v20  ;;  %2302 = vmatpush.msra.mxu0 %v2245_v26  ;;  %v2246_v32 = vand.u32 4294901760, %v2245_v26 }
 0x22d   : > { %2150 = vmatmul.f32.vlgmr.msrb.gmra.mxu2 %v2149_v12  ;;  %2305 = vmatmul.f32.vlgmr.msra.gmra.mxu0 %v2146_v9 }
 0x22e   : > { %2355 = vmatpush.msra.mxu2 %v5208_v43  ;;  %v2247_v56 = vsub.f32 %v2245_v26, %v2246_v32 }
 0x230   : > { %2359 = vmatpush.msra.mxu2 %v2168_v28  ;;  %v2248_v5 = vand.u32 4294901760, %v2247_v56 }
 0x232   : > { %2363 = vmatpush.msra.mxu2 %v2174_v35  ;;  %2249 = vmatpush.msrb.mxu3 %v2248_v5 }
 0x233   : > { %2251 = vmatmul.f32.vlgmr.msrb.gmra.mxu3 %v4941_v0 }
 0x234   : > { %2367 = vmatpush.msra.mxu2 %v2180_v48  ;;  %2418 = vmatpush.msra.mxu3 %v4427_v55 }
 0x236   : > { %2371 = vmatpush.msra.mxu2 %v2186_v52  ;;  %2420 = vmatpush.msra.mxu3 %v4459_v11 }
 0x238   : > { %2375 = vmatpush.msra.mxu2 %v2192_v47  ;;  %2422 = vmatpush.msra.mxu3 %v4522_v36 }
 0x23a   : > { %2379 = vmatpush.msra.mxu2 %v2198_v29  ;;  %2424 = vmatpush.msra.mxu3 %v4572_v13 }
 0x23c   : > { %2383 = vmatpush.msra.mxu2 %v2204_v10  ;;  %2426 = vmatpush.msra.mxu3 %v4622_v41 }
 0x23e   : > { %2387 = vmatpush.msra.mxu2 %v2210_v2  ;;  %2428 = vmatpush.msra.mxu3 %v4658_v17 }
 0x240   : > { %2391 = vmatpush.msra.mxu2 %v2216_v1  ;;  %2430 = vmatpush.msra.mxu3 %v4689_v45 }
 0x242   : > { %2395 = vmatpush.msra.mxu2 %v2222_v57  ;;  %2432 = vmatpush.msra.mxu3 %v4722_v39 }
 0x244   : > { %2399 = vmatpush.msra.mxu2 %v2228_v6  ;;  %2434 = vmatpush.msra.mxu3 %v4779_v44 }
 0x246   : > { %2403 = vmatpush.msra.mxu2 %v2234_v38  ;;  %2436 = vmatpush.msra.mxu3 %v4831_v51 }
 0x248   : > { %2407 = vmatpush.msra.mxu2 %v2240_v19  ;;  %2438 = vmatpush.msra.mxu3 %v4854_v21 }
 0x24a   : > { %2411 = vmatpush.msra.mxu2 %v2246_v32  ;;  %2440 = vmatpush.msra.mxu3 %v4899_v37 }
 0x24b   : > { %2413 = vmatmul.f32.vlgmr.msra.gmra.mxu2 %v4941_v0 }
 0x24c   : > { %2442 = vmatpush.msra.mxu3 %v4907_v7 }
 0x24e   : > { %2444 = vmatpush.msra.mxu3 %v4943_v24 }
 0x250   : > { %2446 = vmatpush.msra.mxu3 %v4960_v59 }
 0x252   : > { %2448 = vmatpush.msra.mxu3 %v2143_v42 }
 0x253   : > { %2450 = vmatmul.f32.vlgmr.msra.gmra.mxu3 %v4941_v0 }
 0x261   : > { %v1911_v55 = vpop.f32.mrf.mxu1 }
 0x269   : > { %v1965_v4 = vpop.f32.mrf.mxu2  ;;  %v2110_v35 = vpop.f32.mrf.mxu1 }
 0x26b   : > { %v1810_v16 = vpop.f32.mrf.mxu0 }
 0x26c   : > { %v1912_v11 = vadd.f32 %v1911_v55, %v1810_v16 }
 0x26d   : > { %v2004_v49 = vpop.f32.mrf.mxu3 }
 0x26e   : > { %v1966_v36 = vadd.f32 %v1965_v4, %v1912_v11 }
 0x270   : > { %v2005_v28 = vadd.f32 %v2004_v49, %v1966_v36 }
 0x274   : > { %v2073_v13 = vpop.f32.mrf.mxu0 }
 0x275   : > { %v2074_v8 = vadd.f32 %v2073_v13, %v2005_v28 }
 0x277   : > { %v2111_v41 = vadd.f32 %v2110_v35, %v2074_v8 }
 0x2a8   : > { %v2345_v31 = vpop.f32.mrf.mxu1 }
 0x2aa   : > { %v2306_v52 = vpop.f32.mrf.mxu0 }
 0x2b0   : > { %v2151_v46 = vpop.f32.mrf.mxu2 }
 0x2b1   : > { %v2152_v48 = vadd.f32 %v2151_v46, %v2111_v41 }
 0x2b6   : > { %v2252_v17 = vpop.f32.mrf.mxu3 }
 0x2b7   : > { %v2253_v27 = vadd.f32 %v2252_v17, %v2152_v48 }
 0x2b9   : > { %v2307_v45 = vadd.f32 %v2306_v52, %v2253_v27 }
 0x2bb   : > { %v2346_v39 = vadd.f32 %v2345_v31, %v2307_v45 }
 0x2ce   : > { %v2414_v47 = vpop.f32.mrf.mxu2 }
 0x2cf   : > { %v2415_v54 = vadd.f32 %v2414_v47, %v2346_v39 }
 0x2d6   : > { %v2451_v29 = vpop.f32.mrf.mxu3 }
 0x2d7   : > { %v2452_v44 = vadd.f32 %v2451_v29, %v2415_v54 }
 0x2d9   : > { %v2461_v10 = vperm.slane %v2452_v44, 3 }
 0x2db   : > { %v2462_v51 = vmul.f32 %v2461_v10, %v2460_v50 }
 0x2dd   : > { %v2463_v25 = vsub.f32 %v2462_v51, %v2452_v44 }
 0x2df   : > { %v2464_v2 = vmul.f32 2.0, %v2463_v25 }
 0x2e1   : > { %2465 = vst [vmem:[%s205_s21] sm:$0x7] %v2464_v2 }
 0x2e2   : > { %2866 = shalt.err (!%p2863_p5)
}
 0x2e3   : > { %2688 = dma.vmem_to_hbm [thread:$0]  (%p2982_p4), %s2480_s23, 64, %s2482_s26, %s2467_s27  }
 0x2e4 PF: > { %p2694_p6 = scmp.ge.s32.totalorder %s2917_s17, 2  ;;  %s2493_s6 = sand.u32 1, %s2897_s12  }
 0x2e5   : > { %s2494_s7 = scalar_lea.sflag [#allocation4], %s2493_s6 }
 0x2e6   : > { %p2691_p7 = pnand %p2694_p6, %p2989_p8 }
 0x2e8   : > { %p2692_p9 = pneg %p2691_p7 }
 0x2ea   : > { %2892 = dma.done.wait (%p2692_p9), %s2494_s7, 64  }
 0x2eb   : > { %2894 = vsyncadd (%p2692_p9), %s2494_s7, 4294967232  ;;  %s16_s17 = sadd.s32 1, %s2917_s17   ;;  %s5209_s12 = smov %s2901_s13 }
 0x2ec   : > { %p13_p10 = scmp.ge.s32.totalorder %s16_s17, 4   ;;  %s5210_s13 = smov %s2905_s14 }
 0x2ed   : > { %s5211_s14 = smov %s2995_s25  ;;  %s5212_s15 = smov %s2913_s16 }
 0x2ee   : > { %s5213_s16 = smov %s5215_s20  ;;  %15 = sbr.rel (!%p13_p10) target bundleno = 4 (0x4), region = 81 }
 0x2f3   :  { %2500 = vsyncpa [#allocation4], 1 }
 0x2f4   :  { %2502 = vsyncpa [#allocation4 + $0x1], 1 }

</bundles_post_ra>
